<compile_context>
chip_gen: v7x
topology: tpu7x:2x2x1
jax: 0.10.0
libtpu: 0.0.40
codegen_flags: <defaults>
</compile_context>

<pallas_src>
import math
import functools

import jax
import jax.numpy as jnp
from jax.experimental import pallas as pl
from jax.experimental.pallas import tpu as pltpu


# ----------------------------------------------------------------------------
# Helpers
# ----------------------------------------------------------------------------
def _gelu(x):
    # GPT tanh-approximation gelu (matches the PyTorch `gelu` in the module)
    return 0.5 * x * (1.0 + jnp.tanh(math.sqrt(2.0 / math.pi) * (x + 0.044715 * x * x * x)))


def _layernorm(x, g, b, eps):
    mu = jnp.mean(x, axis=-1, keepdims=True)
    xc = x - mu
    var = jnp.mean(xc * xc, axis=-1, keepdims=True)
    return xc * jax.lax.rsqrt(var + eps) * g + b


# ----------------------------------------------------------------------------
# Pallas kernel
# ----------------------------------------------------------------------------
def fused_reasoner_kernel(x_ref, xk_ref, pos_ref, hmask_ref,
                          wk_ref, bk_ref, wv_ref, bv_ref,
                          waproj_ref, baproj_ref, ln1g_ref, ln1b_ref,
                          wfc_ref, bfc_ref, wmproj_ref, bmproj_ref,
                          ln2g_ref, ln2b_ref,
                          out_ref, *, n_head, n_layer, eps, stable_softmax):
    Bb, S, E = x_ref.shape           # batch block, seq, embed
    Sk = xk_ref.shape[1]             # knowledge seq

    # embedding + positional add (embd dropout is identity in eval mode)
    hidden = (x_ref[...] + pos_ref[...][None, :, :]).reshape(Bb * S, E)   # (Bb*S, E)
    xk = xk_ref[...].reshape(Bb * Sk, E)                                  # (Bb*Sk, E)

    # TODO(synk): for deep models convert this static unroll to lax.fori_loop with
    # dynamic ref[l] indexing to bound vreg live ranges; fine at n_layer=2.
    for l in range(n_layer):
        # ---- attention: q from hidden, k/v from the knowledge sequence ----
        # Separate key/value weights (both start at lane 0); 1/sqrt(head_dim)
        # is pre-folded into wk AND bk in the wrapper (bias is part of k).
        k = jnp.dot(xk, wk_ref[l], preferred_element_type=jnp.float32) + bk_ref[l]   # (Bb*Sk, E)
        v = jnp.dot(xk, wv_ref[l], preferred_element_type=jnp.float32) + bv_ref[l]   # (Bb*Sk, E)

        q3 = hidden.reshape(Bb, S, E)
        k3 = k.reshape(Bb, Sk, E)
        v3 = v.reshape(Bb, Sk, E)

        a3 = None
        for h in range(n_head):                      # static unroll over heads
            m3 = hmask_ref[h][None, :, :]            # (1, 1, E) 0/1 mask on head-h lanes
            # Masked-q contraction over full E == exact per-head hd-wide dot.
            w = jnp.einsum('bqe,bke->bqk', q3 * m3, k3,
                           preferred_element_type=jnp.float32)            # (Bb, S, Sk)
            if stable_softmax:
                w = w - jnp.max(w, axis=-1, keepdims=True)
            ew = jnp.exp(w)
            p = ew / jnp.sum(ew, axis=-1, keepdims=True)                  # attn dropout = id
            # Masked-v: head-h output lands directly in its own lane columns.
            o_h = jnp.einsum('bqk,bke->bqe', p, v3 * m3,
                             preferred_element_type=jnp.float32)          # (Bb, S, E)
            a3 = o_h if a3 is None else a3 + o_h     # merge_heads == sum of masked outputs

        a = a3.reshape(Bb * S, E)
        attn_out = (jnp.dot(a, waproj_ref[l], preferred_element_type=jnp.float32)
                    + baproj_ref[l])                                      # resid dropout = id

        p1 = _layernorm(hidden + attn_out, ln1g_ref[l], ln1b_ref[l], eps)

        # ---- MLP (4E = 128 lane-dense intermediate) ----
        h1 = jnp.dot(p1, wfc_ref[l], preferred_element_type=jnp.float32) + bfc_ref[l]   # (Bb*S, 4E)
        mo = jnp.dot(_gelu(h1), wmproj_ref[l], preferred_element_type=jnp.float32) + bmproj_ref[l]

        hidden = _layernorm(p1 + mo, ln2g_ref[l], ln2b_ref[l], eps)

    # DoubleReasonerModel: mean over the sequence axis -> (Bb, E)
    out_ref[...] = jnp.mean(hidden.reshape(Bb, S, E), axis=1)[None, :, :]


# ----------------------------------------------------------------------------
# Wrapper
# ----------------------------------------------------------------------------
def double_reasoner_forward(token_ids, input_ids, input_ids_know, params, cfg,
                            batch_block=None, stable_softmax=False):
    """token_ids: (B, C, S) int32 (shape-only, as in the PyTorch code);
       input_ids: (B*C, S, E) float  (these ARE the input embeddings);
       input_ids_know: (B*C, Sk, E) float knowledge embeddings."""
    S = token_ids.shape[-1]
    B, _, E = input_ids.shape          # B here == B*C (already flattened over choices)
    Sk = input_ids_know.shape[1]
    n_head = cfg['n_head']
    n_layer = cfg['n_layer']
    eps = cfg['layer_norm_epsilon']
    hd = E // n_head
    scale = 1.0 / math.sqrt(hd)

    # Batch blocking: >=2 blocks lets both v7x TensorCores work ("parallel" axis);
    # on single-TC chips (v5e/v6e) pass batch_block=B to fold everything into one step.
    if batch_block is None:
        batch_block = B // 2 if (B >= 2 and B % 2 == 0) else B
    assert B % batch_block == 0, "batch_block must divide B*C"
    Bb = batch_block
    nb = B // Bb

    pos_emb = params['positions_embed'][:S]                        # (S, E)
    layers = params['layers']

    # Stacked, pre-processed weights: query slice of c_attn dropped; key and value
    # columns split into SEPARATE stacks (so neither needs a lane-offset slice
    # in-kernel); attention scale 1/sqrt(hd) folded into key weight AND bias
    # (note: this silently differs from raw checkpoint weights — documented).
    wk = jnp.stack([lp['c_attn_w'][:, E:2 * E] for lp in layers]) * scale   # (L, E, E)
    bk = jnp.stack([lp['c_attn_b'][:, E:2 * E] for lp in layers]) * scale   # (L, 1, E)
    wv = jnp.stack([lp['c_attn_w'][:, 2 * E:] for lp in layers])            # (L, E, E)
    bv = jnp.stack([lp['c_attn_b'][:, 2 * E:] for lp in layers])            # (L, 1, E)
    waproj = jnp.stack([lp['c_proj_w'] for lp in layers])          # (L, E, E)
    baproj = jnp.stack([lp['c_proj_b'] for lp in layers])          # (L, 1, E)
    ln1g = jnp.stack([lp['ln1_g'] for lp in layers])
    ln1b = jnp.stack([lp['ln1_b'] for lp in layers])
    wfc = jnp.stack([lp['fc_w'] for lp in layers])                 # (L, E, 4E)
    bfc = jnp.stack([lp['fc_b'] for lp in layers])
    wmproj = jnp.stack([lp['mproj_w'] for lp in layers])           # (L, 4E, E)
    bmproj = jnp.stack([lp['mproj_b'] for lp in layers])
    ln2g = jnp.stack([lp['ln2_g'] for lp in layers])
    ln2b = jnp.stack([lp['ln2_b'] for lp in layers])

    # 0/1 head-selection masks over the embedding lanes: head h owns columns
    # [h*hd, (h+1)*hd).  Used in-kernel instead of lane slicing / concatenation.
    head_mask = (jnp.arange(E)[None, :] // hd ==
                 jnp.arange(n_head)[:, None]).astype(jnp.float32).reshape(n_head, 1, E)

    inputs = [input_ids, input_ids_know, pos_emb, head_mask,
              wk, bk, wv, bv, waproj, baproj, ln1g, ln1b,
              wfc, bfc, wmproj, bmproj, ln2g, ln2b]

    def batch_spec(a):
        bshape = (Bb,) + tuple(a.shape[1:])
        nrest = a.ndim - 1
        return pl.BlockSpec(bshape, lambda i: (i,) + (0,) * nrest)

    def resident_spec(a):
        zeros = (0,) * a.ndim
        return pl.BlockSpec(a.shape, lambda i: zeros)

    in_specs = [batch_spec(input_ids), batch_spec(input_ids_know)] + \
               [resident_spec(a) for a in inputs[2:]]

    # Advisory cost estimate for XLA's scheduler.
    flops_layer = (2 * 2 * B * Sk * E * E              # k and v projections
                   + n_head * 2 * 2 * B * S * Sk * E   # q k^T + p v (masked, full-E contraction)
                   + 2 * B * S * E * E                 # attention c_proj
                   + 2 * B * S * E * (4 * E)           # mlp fc
                   + 2 * B * S * (4 * E) * E)          # mlp proj
    trans_layer = B * n_head * S * Sk + B * S * 4 * E + 2 * B * S
    bytes_accessed = sum(int(a.size) * 4 for a in inputs) + int(B * E) * 4
    cost = pl.CostEstimate(flops=int(n_layer * flops_layer),
                           transcendentals=int(n_layer * trans_layer),
                           bytes_accessed=int(bytes_accessed))

    kernel = functools.partial(fused_reasoner_kernel,
                               n_head=n_head, n_layer=n_layer, eps=eps,
                               stable_softmax=stable_softmax)

    out = pl.pallas_call(
        kernel,
        out_shape=jax.ShapeDtypeStruct((nb, Bb, E), jnp.float32),
        grid=(nb,),
        in_specs=in_specs,
        out_specs=pl.BlockSpec((1, Bb, E), lambda i: (i, 0, 0)),
        compiler_params=pltpu.CompilerParams(
            dimension_semantics=("parallel",)),   # megacore split across batch blocks (v7x)
        cost_estimate=cost,
    )(*inputs)

    return out.reshape(B, E)


# ----------------------------------------------------------------------------
# Deterministic parameter init (matches module __init__ shapes; std=0.02 for Conv1D)
# ----------------------------------------------------------------------------
def init_params(key, cfg, n_positions=80):
    E = cfg['n_embd']
    keys = jax.random.split(key, 1 + cfg['n_layer'] * 4)
    params = {'positions_embed': jax.random.normal(keys[0], (n_positions, E), jnp.float32)}
    layers = []
    for i in range(cfg['n_layer']):
        k0, k1, k2, k3 = keys[1 + 4 * i: 5 + 4 * i]
        layers.append({
            'c_attn_w': 0.02 * jax.random.normal(k0, (E, 3 * E), jnp.float32),
            'c_attn_b': jnp.zeros((1, 3 * E), jnp.float32),
            'c_proj_w': 0.02 * jax.random.normal(k1, (E, E), jnp.float32),
            'c_proj_b': jnp.zeros((1, E), jnp.float32),
            'ln1_g': jnp.ones((1, E), jnp.float32),
            'ln1_b': jnp.zeros((1, E), jnp.float32),
            'fc_w': 0.02 * jax.random.normal(k2, (E, 4 * E), jnp.float32),
            'fc_b': jnp.zeros((1, 4 * E), jnp.float32),
            'mproj_w': 0.02 * jax.random.normal(k3, (4 * E, E), jnp.float32),
            'mproj_b': jnp.zeros((1, E), jnp.float32),
            'ln2_g': jnp.ones((1, E), jnp.float32),
            'ln2_b': jnp.zeros((1, E), jnp.float32),
        })
    params['layers'] = layers
    # TODO(synk): lm_head / SequenceSummary (multiple_choice_head) are constructed in __init__
    # but never used in DoubleReasonerModel.forward, so they are omitted here.
    return params


# ----------------------------------------------------------------------------
if __name__ == "__main__":
    cfg = {'n_embd': 32, 'n_head': 4, 'n_layer': 2, 'afn': 'gelu',
           'embd_pdrop': 0.1, 'attn_pdrop': 0.1, 'resid_pdrop': 0.1,
           'layer_norm_epsilon': 1e-5, 'output_attentions': True}

    B, C, S, Sk, E = 2, 2, 8, 16, cfg['n_embd']   # batch=2, num_choices=2, seq=8, know_seq=16

    root = jax.random.PRNGKey(0)
    kp, k_tok, k_x, k_xk = jax.random.split(root, 4)

    params = init_params(kp, cfg)
    token_ids = jax.random.randint(k_tok, (B, C, S), 0, 50265, dtype=jnp.int32)
    input_ids = jax.random.normal(k_x, (B * C, S, E), jnp.float32)         # input embeddings
    input_ids_know = jax.random.normal(k_xk, (B * C, Sk, E), jnp.float32)  # knowledge embeddings

    out = double_reasoner_forward(token_ids, input_ids, input_ids_know, params, cfg)
    jax.block_until_ready(out)
    assert out.shape == (B * C, E)
    print("KERNEL_OK")
</pallas_src>

<mosaic_0001>
module attributes {stable_mosaic.version = 11 : i64} {
  func.func @fused_reasoner_kernel(%arg0: i32, %arg1: memref<2x8x32xf32, #tpu.memory_space<vmem>>, %arg2: memref<2x16x32xf32, #tpu.memory_space<vmem>>, %arg3: memref<8x32xf32, #tpu.memory_space<vmem>>, %arg4: memref<4x1x32xf32, #tpu.memory_space<vmem>>, %arg5: memref<2x32x32xf32, #tpu.memory_space<vmem>>, %arg6: memref<2x1x32xf32, #tpu.memory_space<vmem>>, %arg7: memref<2x32x32xf32, #tpu.memory_space<vmem>>, %arg8: memref<2x1x32xf32, #tpu.memory_space<vmem>>, %arg9: memref<2x32x32xf32, #tpu.memory_space<vmem>>, %arg10: memref<2x1x32xf32, #tpu.memory_space<vmem>>, %arg11: memref<2x1x32xf32, #tpu.memory_space<vmem>>, %arg12: memref<2x1x32xf32, #tpu.memory_space<vmem>>, %arg13: memref<2x32x128xf32, #tpu.memory_space<vmem>>, %arg14: memref<2x1x128xf32, #tpu.memory_space<vmem>>, %arg15: memref<2x128x32xf32, #tpu.memory_space<vmem>>, %arg16: memref<2x1x32xf32, #tpu.memory_space<vmem>>, %arg17: memref<2x1x32xf32, #tpu.memory_space<vmem>>, %arg18: memref<2x1x32xf32, #tpu.memory_space<vmem>>, %arg19: memref<1x2x32xf32, #tpu.memory_space<vmem>>) attributes {dimension_semantics = [#tpu.dimension_semantics<parallel>], iteration_bounds = array<i64: 2>, scalar_prefetch = 0 : i64, scratch_operands = 0 : i64, tpu.core_type = #tpu.core_type<tc>, window_params = [{transform_indices = @transform_0, window_bounds = array<i64: 2, 8, 32>}, {transform_indices = @transform_1, window_bounds = array<i64: 2, 16, 32>}, {pipeline_mode = #tpu.pipeline_mode<synchronous>, transform_indices = @transform_2, window_bounds = array<i64: 8, 32>}, {pipeline_mode = #tpu.pipeline_mode<synchronous>, transform_indices = @transform_3, window_bounds = array<i64: 4, 1, 32>}, {pipeline_mode = #tpu.pipeline_mode<synchronous>, transform_indices = @transform_4, window_bounds = array<i64: 2, 32, 32>}, {pipeline_mode = #tpu.pipeline_mode<synchronous>, transform_indices = @transform_5, window_bounds = array<i64: 2, 1, 32>}, {pipeline_mode = #tpu.pipeline_mode<synchronous>, transform_indices = @transform_6, window_bounds = array<i64: 2, 32, 32>}, {pipeline_mode = #tpu.pipeline_mode<synchronous>, transform_indices = @transform_7, window_bounds = array<i64: 2, 1, 32>}, {pipeline_mode = #tpu.pipeline_mode<synchronous>, transform_indices = @transform_8, window_bounds = array<i64: 2, 32, 32>}, {pipeline_mode = #tpu.pipeline_mode<synchronous>, transform_indices = @transform_9, window_bounds = array<i64: 2, 1, 32>}, {pipeline_mode = #tpu.pipeline_mode<synchronous>, transform_indices = @transform_10, window_bounds = array<i64: 2, 1, 32>}, {pipeline_mode = #tpu.pipeline_mode<synchronous>, transform_indices = @transform_11, window_bounds = array<i64: 2, 1, 32>}, {pipeline_mode = #tpu.pipeline_mode<synchronous>, transform_indices = @transform_12, window_bounds = array<i64: 2, 32, 128>}, {pipeline_mode = #tpu.pipeline_mode<synchronous>, transform_indices = @transform_13, window_bounds = array<i64: 2, 1, 128>}, {pipeline_mode = #tpu.pipeline_mode<synchronous>, transform_indices = @transform_14, window_bounds = array<i64: 2, 128, 32>}, {pipeline_mode = #tpu.pipeline_mode<synchronous>, transform_indices = @transform_15, window_bounds = array<i64: 2, 1, 32>}, {pipeline_mode = #tpu.pipeline_mode<synchronous>, transform_indices = @transform_16, window_bounds = array<i64: 2, 1, 32>}, {pipeline_mode = #tpu.pipeline_mode<synchronous>, transform_indices = @transform_17, window_bounds = array<i64: 2, 1, 32>}, {transform_indices = @transform_18, window_bounds = array<i64: 1, 2, 32>}]} {
    %c0 = arith.constant 0 : index
    %c0_0 = arith.constant 0 : index
    %c0_1 = arith.constant 0 : index
    %0 = vector.load %arg1[%c0, %c0_0, %c0_1] : memref<2x8x32xf32, #tpu.memory_space<vmem>>, vector<2x8x32xf32>
    %c0_2 = arith.constant 0 : index
    %c0_3 = arith.constant 0 : index
    %1 = vector.load %arg3[%c0_2, %c0_3] : memref<8x32xf32, #tpu.memory_space<vmem>>, vector<8x32xf32>
    %2 = vector.shape_cast %1 : vector<8x32xf32> to vector<1x8x32xf32>
    %3 = vector.broadcast %2 : vector<1x8x32xf32> to vector<2x8x32xf32>
    %4 = arith.addf %0, %3 : vector<2x8x32xf32>
    %5 = vector.shape_cast %4 : vector<2x8x32xf32> to vector<16x32xf32>
    %c0_4 = arith.constant 0 : index
    %c0_5 = arith.constant 0 : index
    %c0_6 = arith.constant 0 : index
    %6 = vector.load %arg2[%c0_4, %c0_5, %c0_6] : memref<2x16x32xf32, #tpu.memory_space<vmem>>, vector<2x16x32xf32>
    %7 = vector.shape_cast %6 : vector<2x16x32xf32> to vector<32x32xf32>
    %c0_7 = arith.constant 0 : index
    %c0_8 = arith.constant 0 : index
    %c0_9 = arith.constant 0 : index
    %8 = vector.load %arg5[%c0_7, %c0_8, %c0_9] : memref<2x32x32xf32, #tpu.memory_space<vmem>>, vector<1x32x32xf32>
    %9 = vector.shape_cast %8 : vector<1x32x32xf32> to vector<32x32xf32>
    %cst = arith.constant dense<0.000000e+00> : vector<32x32xf32>
    %10 = tpu.matmul %7, %9, %cst {dimension_numbers = #tpu.dot_dimension_numbers<[1], [0], [0], [1], [0, 0, 1, 1], [], []>} : vector<32x32xf32>, vector<32x32xf32>, vector<32x32xf32> -> vector<32x32xf32>
    %c0_10 = arith.constant 0 : index
    %c0_11 = arith.constant 0 : index
    %c0_12 = arith.constant 0 : index
    %11 = vector.load %arg6[%c0_10, %c0_11, %c0_12] : memref<2x1x32xf32, #tpu.memory_space<vmem>>, vector<1x1x32xf32>
    %12 = vector.shape_cast %11 : vector<1x1x32xf32> to vector<1x32xf32>
    %13 = vector.broadcast %12 : vector<1x32xf32> to vector<32x32xf32>
    %14 = arith.addf %10, %13 : vector<32x32xf32>
    %c0_13 = arith.constant 0 : index
    %c0_14 = arith.constant 0 : index
    %c0_15 = arith.constant 0 : index
    %15 = vector.load %arg7[%c0_13, %c0_14, %c0_15] : memref<2x32x32xf32, #tpu.memory_space<vmem>>, vector<1x32x32xf32>
    %16 = vector.shape_cast %15 : vector<1x32x32xf32> to vector<32x32xf32>
    %cst_16 = arith.constant dense<0.000000e+00> : vector<32x32xf32>
    %17 = tpu.matmul %7, %16, %cst_16 {dimension_numbers = #tpu.dot_dimension_numbers<[1], [0], [0], [1], [0, 0, 1, 1], [], []>} : vector<32x32xf32>, vector<32x32xf32>, vector<32x32xf32> -> vector<32x32xf32>
    %c0_17 = arith.constant 0 : index
    %c0_18 = arith.constant 0 : index
    %c0_19 = arith.constant 0 : index
    %18 = vector.load %arg8[%c0_17, %c0_18, %c0_19] : memref<2x1x32xf32, #tpu.memory_space<vmem>>, vector<1x1x32xf32>
    %19 = vector.shape_cast %18 : vector<1x1x32xf32> to vector<1x32xf32>
    %20 = vector.broadcast %19 : vector<1x32xf32> to vector<32x32xf32>
    %21 = arith.addf %17, %20 : vector<32x32xf32>
    %22 = vector.shape_cast %5 : vector<16x32xf32> to vector<2x8x32xf32>
    %23 = vector.shape_cast %14 : vector<32x32xf32> to vector<2x16x32xf32>
    %24 = vector.shape_cast %21 : vector<32x32xf32> to vector<2x16x32xf32>
    %c0_20 = arith.constant 0 : index
    %c0_21 = arith.constant 0 : index
    %c0_22 = arith.constant 0 : index
    %25 = vector.load %arg4[%c0_20, %c0_21, %c0_22] : memref<4x1x32xf32, #tpu.memory_space<vmem>>, vector<1x1x32xf32>
    %26 = vector.shape_cast %25 : vector<1x1x32xf32> to vector<1x32xf32>
    %27 = vector.shape_cast %26 : vector<1x32xf32> to vector<1x1x32xf32>
    %28 = vector.broadcast %27 : vector<1x1x32xf32> to vector<2x8x32xf32>
    %29 = arith.mulf %22, %28 : vector<2x8x32xf32>
    "tpu.trace_start"() <{level = 10 : i32, message = "bqe,bke->bqk"}> : () -> ()
    %cst_23 = arith.constant dense<0.000000e+00> : vector<2x8x16xf32>
    %30 = tpu.matmul %29, %23, %cst_23 {dimension_numbers = #tpu.dot_dimension_numbers<[2], [2], [1], [1], [0, 0, 0, 1, 1, 1], [0], [0]>} : vector<2x8x32xf32>, vector<2x16x32xf32>, vector<2x8x16xf32> -> vector<2x8x16xf32>
    "tpu.trace_stop"() : () -> ()
    %31 = math.exp %30 : vector<2x8x16xf32>
    %cst_24 = arith.constant dense<0.000000e+00> : vector<2x8xf32>
    %32 = vector.multi_reduction <add>, %31, %cst_24 [2] : vector<2x8x16xf32> to vector<2x8xf32>
    %33 = vector.shape_cast %32 : vector<2x8xf32> to vector<2x8x1xf32>
    %34 = vector.broadcast %33 : vector<2x8x1xf32> to vector<2x8x16xf32>
    %35 = arith.divf %31, %34 : vector<2x8x16xf32>
    %36 = vector.broadcast %27 : vector<1x1x32xf32> to vector<2x16x32xf32>
    %37 = arith.mulf %24, %36 : vector<2x16x32xf32>
    "tpu.trace_start"() <{level = 10 : i32, message = "bqk,bke->bqe"}> : () -> ()
    %cst_25 = arith.constant dense<0.000000e+00> : vector<2x8x32xf32>
    %38 = tpu.matmul %35, %37, %cst_25 {dimension_numbers = #tpu.dot_dimension_numbers<[2], [1], [1], [2], [0, 0, 0, 1, 1, 2], [0], [0]>} : vector<2x8x16xf32>, vector<2x16x32xf32>, vector<2x8x32xf32> -> vector<2x8x32xf32>
    "tpu.trace_stop"() : () -> ()
    %c1 = arith.constant 1 : index
    %c0_26 = arith.constant 0 : index
    %c0_27 = arith.constant 0 : index
    %39 = vector.load %arg4[%c1, %c0_26, %c0_27] : memref<4x1x32xf32, #tpu.memory_space<vmem>>, vector<1x1x32xf32>
    %40 = vector.shape_cast %39 : vector<1x1x32xf32> to vector<1x32xf32>
    %41 = vector.shape_cast %40 : vector<1x32xf32> to vector<1x1x32xf32>
    %42 = vector.broadcast %41 : vector<1x1x32xf32> to vector<2x8x32xf32>
    %43 = arith.mulf %22, %42 : vector<2x8x32xf32>
    "tpu.trace_start"() <{level = 10 : i32, message = "bqe,bke->bqk"}> : () -> ()
    %cst_28 = arith.constant dense<0.000000e+00> : vector<2x8x16xf32>
    %44 = tpu.matmul %43, %23, %cst_28 {dimension_numbers = #tpu.dot_dimension_numbers<[2], [2], [1], [1], [0, 0, 0, 1, 1, 1], [0], [0]>} : vector<2x8x32xf32>, vector<2x16x32xf32>, vector<2x8x16xf32> -> vector<2x8x16xf32>
    "tpu.trace_stop"() : () -> ()
    %45 = math.exp %44 : vector<2x8x16xf32>
    %cst_29 = arith.constant dense<0.000000e+00> : vector<2x8xf32>
    %46 = vector.multi_reduction <add>, %45, %cst_29 [2] : vector<2x8x16xf32> to vector<2x8xf32>
    %47 = vector.shape_cast %46 : vector<2x8xf32> to vector<2x8x1xf32>
    %48 = vector.broadcast %47 : vector<2x8x1xf32> to vector<2x8x16xf32>
    %49 = arith.divf %45, %48 : vector<2x8x16xf32>
    %50 = vector.broadcast %41 : vector<1x1x32xf32> to vector<2x16x32xf32>
    %51 = arith.mulf %24, %50 : vector<2x16x32xf32>
    "tpu.trace_start"() <{level = 10 : i32, message = "bqk,bke->bqe"}> : () -> ()
    %cst_30 = arith.constant dense<0.000000e+00> : vector<2x8x32xf32>
    %52 = tpu.matmul %49, %51, %cst_30 {dimension_numbers = #tpu.dot_dimension_numbers<[2], [1], [1], [2], [0, 0, 0, 1, 1, 2], [0], [0]>} : vector<2x8x16xf32>, vector<2x16x32xf32>, vector<2x8x32xf32> -> vector<2x8x32xf32>
    "tpu.trace_stop"() : () -> ()
    %53 = arith.addf %38, %52 : vector<2x8x32xf32>
    %c2 = arith.constant 2 : index
    %c0_31 = arith.constant 0 : index
    %c0_32 = arith.constant 0 : index
    %54 = vector.load %arg4[%c2, %c0_31, %c0_32] : memref<4x1x32xf32, #tpu.memory_space<vmem>>, vector<1x1x32xf32>
    %55 = vector.shape_cast %54 : vector<1x1x32xf32> to vector<1x32xf32>
    %56 = vector.shape_cast %55 : vector<1x32xf32> to vector<1x1x32xf32>
    %57 = vector.broadcast %56 : vector<1x1x32xf32> to vector<2x8x32xf32>
    %58 = arith.mulf %22, %57 : vector<2x8x32xf32>
    "tpu.trace_start"() <{level = 10 : i32, message = "bqe,bke->bqk"}> : () -> ()
    %cst_33 = arith.constant dense<0.000000e+00> : vector<2x8x16xf32>
    %59 = tpu.matmul %58, %23, %cst_33 {dimension_numbers = #tpu.dot_dimension_numbers<[2], [2], [1], [1], [0, 0, 0, 1, 1, 1], [0], [0]>} : vector<2x8x32xf32>, vector<2x16x32xf32>, vector<2x8x16xf32> -> vector<2x8x16xf32>
    "tpu.trace_stop"() : () -> ()
    %60 = math.exp %59 : vector<2x8x16xf32>
    %cst_34 = arith.constant dense<0.000000e+00> : vector<2x8xf32>
    %61 = vector.multi_reduction <add>, %60, %cst_34 [2] : vector<2x8x16xf32> to vector<2x8xf32>
    %62 = vector.shape_cast %61 : vector<2x8xf32> to vector<2x8x1xf32>
    %63 = vector.broadcast %62 : vector<2x8x1xf32> to vector<2x8x16xf32>
    %64 = arith.divf %60, %63 : vector<2x8x16xf32>
    %65 = vector.broadcast %56 : vector<1x1x32xf32> to vector<2x16x32xf32>
    %66 = arith.mulf %24, %65 : vector<2x16x32xf32>
    "tpu.trace_start"() <{level = 10 : i32, message = "bqk,bke->bqe"}> : () -> ()
    %cst_35 = arith.constant dense<0.000000e+00> : vector<2x8x32xf32>
    %67 = tpu.matmul %64, %66, %cst_35 {dimension_numbers = #tpu.dot_dimension_numbers<[2], [1], [1], [2], [0, 0, 0, 1, 1, 2], [0], [0]>} : vector<2x8x16xf32>, vector<2x16x32xf32>, vector<2x8x32xf32> -> vector<2x8x32xf32>
    "tpu.trace_stop"() : () -> ()
    %68 = arith.addf %53, %67 : vector<2x8x32xf32>
    %c3 = arith.constant 3 : index
    %c0_36 = arith.constant 0 : index
    %c0_37 = arith.constant 0 : index
    %69 = vector.load %arg4[%c3, %c0_36, %c0_37] : memref<4x1x32xf32, #tpu.memory_space<vmem>>, vector<1x1x32xf32>
    %70 = vector.shape_cast %69 : vector<1x1x32xf32> to vector<1x32xf32>
    %71 = vector.shape_cast %70 : vector<1x32xf32> to vector<1x1x32xf32>
    %72 = vector.broadcast %71 : vector<1x1x32xf32> to vector<2x8x32xf32>
    %73 = arith.mulf %22, %72 : vector<2x8x32xf32>
    "tpu.trace_start"() <{level = 10 : i32, message = "bqe,bke->bqk"}> : () -> ()
    %cst_38 = arith.constant dense<0.000000e+00> : vector<2x8x16xf32>
    %74 = tpu.matmul %73, %23, %cst_38 {dimension_numbers = #tpu.dot_dimension_numbers<[2], [2], [1], [1], [0, 0, 0, 1, 1, 1], [0], [0]>} : vector<2x8x32xf32>, vector<2x16x32xf32>, vector<2x8x16xf32> -> vector<2x8x16xf32>
    "tpu.trace_stop"() : () -> ()
    %75 = math.exp %74 : vector<2x8x16xf32>
    %cst_39 = arith.constant dense<0.000000e+00> : vector<2x8xf32>
    %76 = vector.multi_reduction <add>, %75, %cst_39 [2] : vector<2x8x16xf32> to vector<2x8xf32>
    %77 = vector.shape_cast %76 : vector<2x8xf32> to vector<2x8x1xf32>
    %78 = vector.broadcast %77 : vector<2x8x1xf32> to vector<2x8x16xf32>
    %79 = arith.divf %75, %78 : vector<2x8x16xf32>
    %80 = vector.broadcast %71 : vector<1x1x32xf32> to vector<2x16x32xf32>
    %81 = arith.mulf %24, %80 : vector<2x16x32xf32>
    "tpu.trace_start"() <{level = 10 : i32, message = "bqk,bke->bqe"}> : () -> ()
    %cst_40 = arith.constant dense<0.000000e+00> : vector<2x8x32xf32>
    %82 = tpu.matmul %79, %81, %cst_40 {dimension_numbers = #tpu.dot_dimension_numbers<[2], [1], [1], [2], [0, 0, 0, 1, 1, 2], [0], [0]>} : vector<2x8x16xf32>, vector<2x16x32xf32>, vector<2x8x32xf32> -> vector<2x8x32xf32>
    "tpu.trace_stop"() : () -> ()
    %83 = arith.addf %68, %82 : vector<2x8x32xf32>
    %84 = vector.shape_cast %83 : vector<2x8x32xf32> to vector<16x32xf32>
    %c0_41 = arith.constant 0 : index
    %c0_42 = arith.constant 0 : index
    %c0_43 = arith.constant 0 : index
    %85 = vector.load %arg9[%c0_41, %c0_42, %c0_43] : memref<2x32x32xf32, #tpu.memory_space<vmem>>, vector<1x32x32xf32>
    %86 = vector.shape_cast %85 : vector<1x32x32xf32> to vector<32x32xf32>
    %cst_44 = arith.constant dense<0.000000e+00> : vector<16x32xf32>
    %87 = tpu.matmul %84, %86, %cst_44 {dimension_numbers = #tpu.dot_dimension_numbers<[1], [0], [0], [1], [0, 0, 1, 1], [], []>} : vector<16x32xf32>, vector<32x32xf32>, vector<16x32xf32> -> vector<16x32xf32>
    %c0_45 = arith.constant 0 : index
    %c0_46 = arith.constant 0 : index
    %c0_47 = arith.constant 0 : index
    %88 = vector.load %arg10[%c0_45, %c0_46, %c0_47] : memref<2x1x32xf32, #tpu.memory_space<vmem>>, vector<1x1x32xf32>
    %89 = vector.shape_cast %88 : vector<1x1x32xf32> to vector<1x32xf32>
    %90 = vector.broadcast %89 : vector<1x32xf32> to vector<16x32xf32>
    %91 = arith.addf %87, %90 : vector<16x32xf32>
    %92 = arith.addf %5, %91 : vector<16x32xf32>
    %c0_48 = arith.constant 0 : index
    %c0_49 = arith.constant 0 : index
    %c0_50 = arith.constant 0 : index
    %93 = vector.load %arg11[%c0_48, %c0_49, %c0_50] : memref<2x1x32xf32, #tpu.memory_space<vmem>>, vector<1x1x32xf32>
    %94 = vector.shape_cast %93 : vector<1x1x32xf32> to vector<1x32xf32>
    %c0_51 = arith.constant 0 : index
    %c0_52 = arith.constant 0 : index
    %c0_53 = arith.constant 0 : index
    %95 = vector.load %arg12[%c0_51, %c0_52, %c0_53] : memref<2x1x32xf32, #tpu.memory_space<vmem>>, vector<1x1x32xf32>
    %96 = vector.shape_cast %95 : vector<1x1x32xf32> to vector<1x32xf32>
    %cst_54 = arith.constant dense<0.000000e+00> : vector<16xf32>
    %97 = vector.multi_reduction <add>, %92, %cst_54 [1] : vector<16x32xf32> to vector<16xf32>
    %98 = vector.shape_cast %97 : vector<16xf32> to vector<16x1xf32>
    %cst_55 = arith.constant 3.200000e+01 : f32
    %99 = vector.broadcast %cst_55 : f32 to vector<16x1xf32>
    %100 = arith.divf %98, %99 : vector<16x1xf32>
    %101 = vector.broadcast %100 : vector<16x1xf32> to vector<16x32xf32>
    %102 = arith.subf %92, %101 : vector<16x32xf32>
    %103 = arith.mulf %102, %102 : vector<16x32xf32>
    %cst_56 = arith.constant dense<0.000000e+00> : vector<16xf32>
    %104 = vector.multi_reduction <add>, %103, %cst_56 [1] : vector<16x32xf32> to vector<16xf32>
    %105 = vector.shape_cast %104 : vector<16xf32> to vector<16x1xf32>
    %cst_57 = arith.constant 3.200000e+01 : f32
    %106 = vector.broadcast %cst_57 : f32 to vector<16x1xf32>
    %107 = arith.divf %105, %106 : vector<16x1xf32>
    %cst_58 = arith.constant 9.99999974E-6 : f32
    %108 = vector.broadcast %cst_58 : f32 to vector<16x1xf32>
    %109 = arith.addf %107, %108 : vector<16x1xf32>
    %110 = math.rsqrt %109 : vector<16x1xf32>
    %111 = vector.broadcast %110 : vector<16x1xf32> to vector<16x32xf32>
    %112 = arith.mulf %102, %111 : vector<16x32xf32>
    %113 = vector.broadcast %94 : vector<1x32xf32> to vector<16x32xf32>
    %114 = arith.mulf %112, %113 : vector<16x32xf32>
    %115 = vector.broadcast %96 : vector<1x32xf32> to vector<16x32xf32>
    %116 = arith.addf %114, %115 : vector<16x32xf32>
    %c0_59 = arith.constant 0 : index
    %c0_60 = arith.constant 0 : index
    %c0_61 = arith.constant 0 : index
    %117 = vector.load %arg13[%c0_59, %c0_60, %c0_61] : memref<2x32x128xf32, #tpu.memory_space<vmem>>, vector<1x32x128xf32>
    %118 = vector.shape_cast %117 : vector<1x32x128xf32> to vector<32x128xf32>
    %cst_62 = arith.constant dense<0.000000e+00> : vector<16x128xf32>
    %119 = tpu.matmul %116, %118, %cst_62 {dimension_numbers = #tpu.dot_dimension_numbers<[1], [0], [0], [1], [0, 0, 1, 1], [], []>} : vector<16x32xf32>, vector<32x128xf32>, vector<16x128xf32> -> vector<16x128xf32>
    %c0_63 = arith.constant 0 : index
    %c0_64 = arith.constant 0 : index
    %c0_65 = arith.constant 0 : index
    %120 = vector.load %arg14[%c0_63, %c0_64, %c0_65] : memref<2x1x128xf32, #tpu.memory_space<vmem>>, vector<1x1x128xf32>
    %121 = vector.shape_cast %120 : vector<1x1x128xf32> to vector<1x128xf32>
    %122 = vector.broadcast %121 : vector<1x128xf32> to vector<16x128xf32>
    %123 = arith.addf %119, %122 : vector<16x128xf32>
    %cst_66 = arith.constant 5.000000e-01 : f32
    %124 = vector.broadcast %cst_66 : f32 to vector<16x128xf32>
    %125 = arith.mulf %124, %123 : vector<16x128xf32>
    %cst_67 = arith.constant 4.471500e-02 : f32
    %126 = vector.broadcast %cst_67 : f32 to vector<16x128xf32>
    %127 = arith.mulf %126, %123 : vector<16x128xf32>
    %128 = arith.mulf %127, %123 : vector<16x128xf32>
    %129 = arith.mulf %128, %123 : vector<16x128xf32>
    %130 = arith.addf %123, %129 : vector<16x128xf32>
    %cst_68 = arith.constant 0.797884583 : f32
    %131 = vector.broadcast %cst_68 : f32 to vector<16x128xf32>
    %132 = arith.mulf %131, %130 : vector<16x128xf32>
    %133 = math.tanh %132 : vector<16x128xf32>
    %cst_69 = arith.constant 1.000000e+00 : f32
    %134 = vector.broadcast %cst_69 : f32 to vector<16x128xf32>
    %135 = arith.addf %134, %133 : vector<16x128xf32>
    %136 = arith.mulf %125, %135 : vector<16x128xf32>
    %c0_70 = arith.constant 0 : index
    %c0_71 = arith.constant 0 : index
    %c0_72 = arith.constant 0 : index
    %137 = vector.load %arg15[%c0_70, %c0_71, %c0_72] : memref<2x128x32xf32, #tpu.memory_space<vmem>>, vector<1x128x32xf32>
    %138 = vector.shape_cast %137 : vector<1x128x32xf32> to vector<128x32xf32>
    %cst_73 = arith.constant dense<0.000000e+00> : vector<16x32xf32>
    %139 = tpu.matmul %136, %138, %cst_73 {dimension_numbers = #tpu.dot_dimension_numbers<[1], [0], [0], [1], [0, 0, 1, 1], [], []>} : vector<16x128xf32>, vector<128x32xf32>, vector<16x32xf32> -> vector<16x32xf32>
    %c0_74 = arith.constant 0 : index
    %c0_75 = arith.constant 0 : index
    %c0_76 = arith.constant 0 : index
    %140 = vector.load %arg16[%c0_74, %c0_75, %c0_76] : memref<2x1x32xf32, #tpu.memory_space<vmem>>, vector<1x1x32xf32>
    %141 = vector.shape_cast %140 : vector<1x1x32xf32> to vector<1x32xf32>
    %142 = vector.broadcast %141 : vector<1x32xf32> to vector<16x32xf32>
    %143 = arith.addf %139, %142 : vector<16x32xf32>
    %144 = arith.addf %116, %143 : vector<16x32xf32>
    %c0_77 = arith.constant 0 : index
    %c0_78 = arith.constant 0 : index
    %c0_79 = arith.constant 0 : index
    %145 = vector.load %arg17[%c0_77, %c0_78, %c0_79] : memref<2x1x32xf32, #tpu.memory_space<vmem>>, vector<1x1x32xf32>
    %146 = vector.shape_cast %145 : vector<1x1x32xf32> to vector<1x32xf32>
    %c0_80 = arith.constant 0 : index
    %c0_81 = arith.constant 0 : index
    %c0_82 = arith.constant 0 : index
    %147 = vector.load %arg18[%c0_80, %c0_81, %c0_82] : memref<2x1x32xf32, #tpu.memory_space<vmem>>, vector<1x1x32xf32>
    %148 = vector.shape_cast %147 : vector<1x1x32xf32> to vector<1x32xf32>
    %cst_83 = arith.constant dense<0.000000e+00> : vector<16xf32>
    %149 = vector.multi_reduction <add>, %144, %cst_83 [1] : vector<16x32xf32> to vector<16xf32>
    %150 = vector.shape_cast %149 : vector<16xf32> to vector<16x1xf32>
    %cst_84 = arith.constant 3.200000e+01 : f32
    %151 = vector.broadcast %cst_84 : f32 to vector<16x1xf32>
    %152 = arith.divf %150, %151 : vector<16x1xf32>
    %153 = vector.broadcast %152 : vector<16x1xf32> to vector<16x32xf32>
    %154 = arith.subf %144, %153 : vector<16x32xf32>
    %155 = arith.mulf %154, %154 : vector<16x32xf32>
    %cst_85 = arith.constant dense<0.000000e+00> : vector<16xf32>
    %156 = vector.multi_reduction <add>, %155, %cst_85 [1] : vector<16x32xf32> to vector<16xf32>
    %157 = vector.shape_cast %156 : vector<16xf32> to vector<16x1xf32>
    %cst_86 = arith.constant 3.200000e+01 : f32
    %158 = vector.broadcast %cst_86 : f32 to vector<16x1xf32>
    %159 = arith.divf %157, %158 : vector<16x1xf32>
    %cst_87 = arith.constant 9.99999974E-6 : f32
    %160 = vector.broadcast %cst_87 : f32 to vector<16x1xf32>
    %161 = arith.addf %159, %160 : vector<16x1xf32>
    %162 = math.rsqrt %161 : vector<16x1xf32>
    %163 = vector.broadcast %162 : vector<16x1xf32> to vector<16x32xf32>
    %164 = arith.mulf %154, %163 : vector<16x32xf32>
    %165 = vector.broadcast %146 : vector<1x32xf32> to vector<16x32xf32>
    %166 = arith.mulf %164, %165 : vector<16x32xf32>
    %167 = vector.broadcast %148 : vector<1x32xf32> to vector<16x32xf32>
    %168 = arith.addf %166, %167 : vector<16x32xf32>
    %c1_88 = arith.constant 1 : index
    %c0_89 = arith.constant 0 : index
    %c0_90 = arith.constant 0 : index
    %169 = vector.load %arg5[%c1_88, %c0_89, %c0_90] : memref<2x32x32xf32, #tpu.memory_space<vmem>>, vector<1x32x32xf32>
    %170 = vector.shape_cast %169 : vector<1x32x32xf32> to vector<32x32xf32>
    %cst_91 = arith.constant dense<0.000000e+00> : vector<32x32xf32>
    %171 = tpu.matmul %7, %170, %cst_91 {dimension_numbers = #tpu.dot_dimension_numbers<[1], [0], [0], [1], [0, 0, 1, 1], [], []>} : vector<32x32xf32>, vector<32x32xf32>, vector<32x32xf32> -> vector<32x32xf32>
    %c1_92 = arith.constant 1 : index
    %c0_93 = arith.constant 0 : index
    %c0_94 = arith.constant 0 : index
    %172 = vector.load %arg6[%c1_92, %c0_93, %c0_94] : memref<2x1x32xf32, #tpu.memory_space<vmem>>, vector<1x1x32xf32>
    %173 = vector.shape_cast %172 : vector<1x1x32xf32> to vector<1x32xf32>
    %174 = vector.broadcast %173 : vector<1x32xf32> to vector<32x32xf32>
    %175 = arith.addf %171, %174 : vector<32x32xf32>
    %c1_95 = arith.constant 1 : index
    %c0_96 = arith.constant 0 : index
    %c0_97 = arith.constant 0 : index
    %176 = vector.load %arg7[%c1_95, %c0_96, %c0_97] : memref<2x32x32xf32, #tpu.memory_space<vmem>>, vector<1x32x32xf32>
    %177 = vector.shape_cast %176 : vector<1x32x32xf32> to vector<32x32xf32>
    %cst_98 = arith.constant dense<0.000000e+00> : vector<32x32xf32>
    %178 = tpu.matmul %7, %177, %cst_98 {dimension_numbers = #tpu.dot_dimension_numbers<[1], [0], [0], [1], [0, 0, 1, 1], [], []>} : vector<32x32xf32>, vector<32x32xf32>, vector<32x32xf32> -> vector<32x32xf32>
    %c1_99 = arith.constant 1 : index
    %c0_100 = arith.constant 0 : index
    %c0_101 = arith.constant 0 : index
    %179 = vector.load %arg8[%c1_99, %c0_100, %c0_101] : memref<2x1x32xf32, #tpu.memory_space<vmem>>, vector<1x1x32xf32>
    %180 = vector.shape_cast %179 : vector<1x1x32xf32> to vector<1x32xf32>
    %181 = vector.broadcast %180 : vector<1x32xf32> to vector<32x32xf32>
    %182 = arith.addf %178, %181 : vector<32x32xf32>
    %183 = vector.shape_cast %168 : vector<16x32xf32> to vector<2x8x32xf32>
    %184 = vector.shape_cast %175 : vector<32x32xf32> to vector<2x16x32xf32>
    %185 = vector.shape_cast %182 : vector<32x32xf32> to vector<2x16x32xf32>
    %c0_102 = arith.constant 0 : index
    %c0_103 = arith.constant 0 : index
    %c0_104 = arith.constant 0 : index
    %186 = vector.load %arg4[%c0_102, %c0_103, %c0_104] : memref<4x1x32xf32, #tpu.memory_space<vmem>>, vector<1x1x32xf32>
    %187 = vector.shape_cast %186 : vector<1x1x32xf32> to vector<1x32xf32>
    %188 = vector.shape_cast %187 : vector<1x32xf32> to vector<1x1x32xf32>
    %189 = vector.broadcast %188 : vector<1x1x32xf32> to vector<2x8x32xf32>
    %190 = arith.mulf %183, %189 : vector<2x8x32xf32>
    "tpu.trace_start"() <{level = 10 : i32, message = "bqe,bke->bqk"}> : () -> ()
    %cst_105 = arith.constant dense<0.000000e+00> : vector<2x8x16xf32>
    %191 = tpu.matmul %190, %184, %cst_105 {dimension_numbers = #tpu.dot_dimension_numbers<[2], [2], [1], [1], [0, 0, 0, 1, 1, 1], [0], [0]>} : vector<2x8x32xf32>, vector<2x16x32xf32>, vector<2x8x16xf32> -> vector<2x8x16xf32>
    "tpu.trace_stop"() : () -> ()
    %192 = math.exp %191 : vector<2x8x16xf32>
    %cst_106 = arith.constant dense<0.000000e+00> : vector<2x8xf32>
    %193 = vector.multi_reduction <add>, %192, %cst_106 [2] : vector<2x8x16xf32> to vector<2x8xf32>
    %194 = vector.shape_cast %193 : vector<2x8xf32> to vector<2x8x1xf32>
    %195 = vector.broadcast %194 : vector<2x8x1xf32> to vector<2x8x16xf32>
    %196 = arith.divf %192, %195 : vector<2x8x16xf32>
    %197 = vector.broadcast %188 : vector<1x1x32xf32> to vector<2x16x32xf32>
    %198 = arith.mulf %185, %197 : vector<2x16x32xf32>
    "tpu.trace_start"() <{level = 10 : i32, message = "bqk,bke->bqe"}> : () -> ()
    %cst_107 = arith.constant dense<0.000000e+00> : vector<2x8x32xf32>
    %199 = tpu.matmul %196, %198, %cst_107 {dimension_numbers = #tpu.dot_dimension_numbers<[2], [1], [1], [2], [0, 0, 0, 1, 1, 2], [0], [0]>} : vector<2x8x16xf32>, vector<2x16x32xf32>, vector<2x8x32xf32> -> vector<2x8x32xf32>
    "tpu.trace_stop"() : () -> ()
    %c1_108 = arith.constant 1 : index
    %c0_109 = arith.constant 0 : index
    %c0_110 = arith.constant 0 : index
    %200 = vector.load %arg4[%c1_108, %c0_109, %c0_110] : memref<4x1x32xf32, #tpu.memory_space<vmem>>, vector<1x1x32xf32>
    %201 = vector.shape_cast %200 : vector<1x1x32xf32> to vector<1x32xf32>
    %202 = vector.shape_cast %201 : vector<1x32xf32> to vector<1x1x32xf32>
    %203 = vector.broadcast %202 : vector<1x1x32xf32> to vector<2x8x32xf32>
    %204 = arith.mulf %183, %203 : vector<2x8x32xf32>
    "tpu.trace_start"() <{level = 10 : i32, message = "bqe,bke->bqk"}> : () -> ()
    %cst_111 = arith.constant dense<0.000000e+00> : vector<2x8x16xf32>
    %205 = tpu.matmul %204, %184, %cst_111 {dimension_numbers = #tpu.dot_dimension_numbers<[2], [2], [1], [1], [0, 0, 0, 1, 1, 1], [0], [0]>} : vector<2x8x32xf32>, vector<2x16x32xf32>, vector<2x8x16xf32> -> vector<2x8x16xf32>
    "tpu.trace_stop"() : () -> ()
    %206 = math.exp %205 : vector<2x8x16xf32>
    %cst_112 = arith.constant dense<0.000000e+00> : vector<2x8xf32>
    %207 = vector.multi_reduction <add>, %206, %cst_112 [2] : vector<2x8x16xf32> to vector<2x8xf32>
    %208 = vector.shape_cast %207 : vector<2x8xf32> to vector<2x8x1xf32>
    %209 = vector.broadcast %208 : vector<2x8x1xf32> to vector<2x8x16xf32>
    %210 = arith.divf %206, %209 : vector<2x8x16xf32>
    %211 = vector.broadcast %202 : vector<1x1x32xf32> to vector<2x16x32xf32>
    %212 = arith.mulf %185, %211 : vector<2x16x32xf32>
    "tpu.trace_start"() <{level = 10 : i32, message = "bqk,bke->bqe"}> : () -> ()
    %cst_113 = arith.constant dense<0.000000e+00> : vector<2x8x32xf32>
    %213 = tpu.matmul %210, %212, %cst_113 {dimension_numbers = #tpu.dot_dimension_numbers<[2], [1], [1], [2], [0, 0, 0, 1, 1, 2], [0], [0]>} : vector<2x8x16xf32>, vector<2x16x32xf32>, vector<2x8x32xf32> -> vector<2x8x32xf32>
    "tpu.trace_stop"() : () -> ()
    %214 = arith.addf %199, %213 : vector<2x8x32xf32>
    %c2_114 = arith.constant 2 : index
    %c0_115 = arith.constant 0 : index
    %c0_116 = arith.constant 0 : index
    %215 = vector.load %arg4[%c2_114, %c0_115, %c0_116] : memref<4x1x32xf32, #tpu.memory_space<vmem>>, vector<1x1x32xf32>
    %216 = vector.shape_cast %215 : vector<1x1x32xf32> to vector<1x32xf32>
    %217 = vector.shape_cast %216 : vector<1x32xf32> to vector<1x1x32xf32>
    %218 = vector.broadcast %217 : vector<1x1x32xf32> to vector<2x8x32xf32>
    %219 = arith.mulf %183, %218 : vector<2x8x32xf32>
    "tpu.trace_start"() <{level = 10 : i32, message = "bqe,bke->bqk"}> : () -> ()
    %cst_117 = arith.constant dense<0.000000e+00> : vector<2x8x16xf32>
    %220 = tpu.matmul %219, %184, %cst_117 {dimension_numbers = #tpu.dot_dimension_numbers<[2], [2], [1], [1], [0, 0, 0, 1, 1, 1], [0], [0]>} : vector<2x8x32xf32>, vector<2x16x32xf32>, vector<2x8x16xf32> -> vector<2x8x16xf32>
    "tpu.trace_stop"() : () -> ()
    %221 = math.exp %220 : vector<2x8x16xf32>
    %cst_118 = arith.constant dense<0.000000e+00> : vector<2x8xf32>
    %222 = vector.multi_reduction <add>, %221, %cst_118 [2] : vector<2x8x16xf32> to vector<2x8xf32>
    %223 = vector.shape_cast %222 : vector<2x8xf32> to vector<2x8x1xf32>
    %224 = vector.broadcast %223 : vector<2x8x1xf32> to vector<2x8x16xf32>
    %225 = arith.divf %221, %224 : vector<2x8x16xf32>
    %226 = vector.broadcast %217 : vector<1x1x32xf32> to vector<2x16x32xf32>
    %227 = arith.mulf %185, %226 : vector<2x16x32xf32>
    "tpu.trace_start"() <{level = 10 : i32, message = "bqk,bke->bqe"}> : () -> ()
    %cst_119 = arith.constant dense<0.000000e+00> : vector<2x8x32xf32>
    %228 = tpu.matmul %225, %227, %cst_119 {dimension_numbers = #tpu.dot_dimension_numbers<[2], [1], [1], [2], [0, 0, 0, 1, 1, 2], [0], [0]>} : vector<2x8x16xf32>, vector<2x16x32xf32>, vector<2x8x32xf32> -> vector<2x8x32xf32>
    "tpu.trace_stop"() : () -> ()
    %229 = arith.addf %214, %228 : vector<2x8x32xf32>
    %c3_120 = arith.constant 3 : index
    %c0_121 = arith.constant 0 : index
    %c0_122 = arith.constant 0 : index
    %230 = vector.load %arg4[%c3_120, %c0_121, %c0_122] : memref<4x1x32xf32, #tpu.memory_space<vmem>>, vector<1x1x32xf32>
    %231 = vector.shape_cast %230 : vector<1x1x32xf32> to vector<1x32xf32>
    %232 = vector.shape_cast %231 : vector<1x32xf32> to vector<1x1x32xf32>
    %233 = vector.broadcast %232 : vector<1x1x32xf32> to vector<2x8x32xf32>
    %234 = arith.mulf %183, %233 : vector<2x8x32xf32>
    "tpu.trace_start"() <{level = 10 : i32, message = "bqe,bke->bqk"}> : () -> ()
    %cst_123 = arith.constant dense<0.000000e+00> : vector<2x8x16xf32>
    %235 = tpu.matmul %234, %184, %cst_123 {dimension_numbers = #tpu.dot_dimension_numbers<[2], [2], [1], [1], [0, 0, 0, 1, 1, 1], [0], [0]>} : vector<2x8x32xf32>, vector<2x16x32xf32>, vector<2x8x16xf32> -> vector<2x8x16xf32>
    "tpu.trace_stop"() : () -> ()
    %236 = math.exp %235 : vector<2x8x16xf32>
    %cst_124 = arith.constant dense<0.000000e+00> : vector<2x8xf32>
    %237 = vector.multi_reduction <add>, %236, %cst_124 [2] : vector<2x8x16xf32> to vector<2x8xf32>
    %238 = vector.shape_cast %237 : vector<2x8xf32> to vector<2x8x1xf32>
    %239 = vector.broadcast %238 : vector<2x8x1xf32> to vector<2x8x16xf32>
    %240 = arith.divf %236, %239 : vector<2x8x16xf32>
    %241 = vector.broadcast %232 : vector<1x1x32xf32> to vector<2x16x32xf32>
    %242 = arith.mulf %185, %241 : vector<2x16x32xf32>
    "tpu.trace_start"() <{level = 10 : i32, message = "bqk,bke->bqe"}> : () -> ()
    %cst_125 = arith.constant dense<0.000000e+00> : vector<2x8x32xf32>
    %243 = tpu.matmul %240, %242, %cst_125 {dimension_numbers = #tpu.dot_dimension_numbers<[2], [1], [1], [2], [0, 0, 0, 1, 1, 2], [0], [0]>} : vector<2x8x16xf32>, vector<2x16x32xf32>, vector<2x8x32xf32> -> vector<2x8x32xf32>
    "tpu.trace_stop"() : () -> ()
    %244 = arith.addf %229, %243 : vector<2x8x32xf32>
    %245 = vector.shape_cast %244 : vector<2x8x32xf32> to vector<16x32xf32>
    %c1_126 = arith.constant 1 : index
    %c0_127 = arith.constant 0 : index
    %c0_128 = arith.constant 0 : index
    %246 = vector.load %arg9[%c1_126, %c0_127, %c0_128] : memref<2x32x32xf32, #tpu.memory_space<vmem>>, vector<1x32x32xf32>
    %247 = vector.shape_cast %246 : vector<1x32x32xf32> to vector<32x32xf32>
    %cst_129 = arith.constant dense<0.000000e+00> : vector<16x32xf32>
    %248 = tpu.matmul %245, %247, %cst_129 {dimension_numbers = #tpu.dot_dimension_numbers<[1], [0], [0], [1], [0, 0, 1, 1], [], []>} : vector<16x32xf32>, vector<32x32xf32>, vector<16x32xf32> -> vector<16x32xf32>
    %c1_130 = arith.constant 1 : index
    %c0_131 = arith.constant 0 : index
    %c0_132 = arith.constant 0 : index
    %249 = vector.load %arg10[%c1_130, %c0_131, %c0_132] : memref<2x1x32xf32, #tpu.memory_space<vmem>>, vector<1x1x32xf32>
    %250 = vector.shape_cast %249 : vector<1x1x32xf32> to vector<1x32xf32>
    %251 = vector.broadcast %250 : vector<1x32xf32> to vector<16x32xf32>
    %252 = arith.addf %248, %251 : vector<16x32xf32>
    %253 = arith.addf %168, %252 : vector<16x32xf32>
    %c1_133 = arith.constant 1 : index
    %c0_134 = arith.constant 0 : index
    %c0_135 = arith.constant 0 : index
    %254 = vector.load %arg11[%c1_133, %c0_134, %c0_135] : memref<2x1x32xf32, #tpu.memory_space<vmem>>, vector<1x1x32xf32>
    %255 = vector.shape_cast %254 : vector<1x1x32xf32> to vector<1x32xf32>
    %c1_136 = arith.constant 1 : index
    %c0_137 = arith.constant 0 : index
    %c0_138 = arith.constant 0 : index
    %256 = vector.load %arg12[%c1_136, %c0_137, %c0_138] : memref<2x1x32xf32, #tpu.memory_space<vmem>>, vector<1x1x32xf32>
    %257 = vector.shape_cast %256 : vector<1x1x32xf32> to vector<1x32xf32>
    %cst_139 = arith.constant dense<0.000000e+00> : vector<16xf32>
    %258 = vector.multi_reduction <add>, %253, %cst_139 [1] : vector<16x32xf32> to vector<16xf32>
    %259 = vector.shape_cast %258 : vector<16xf32> to vector<16x1xf32>
    %cst_140 = arith.constant 3.200000e+01 : f32
    %260 = vector.broadcast %cst_140 : f32 to vector<16x1xf32>
    %261 = arith.divf %259, %260 : vector<16x1xf32>
    %262 = vector.broadcast %261 : vector<16x1xf32> to vector<16x32xf32>
    %263 = arith.subf %253, %262 : vector<16x32xf32>
    %264 = arith.mulf %263, %263 : vector<16x32xf32>
    %cst_141 = arith.constant dense<0.000000e+00> : vector<16xf32>
    %265 = vector.multi_reduction <add>, %264, %cst_141 [1] : vector<16x32xf32> to vector<16xf32>
    %266 = vector.shape_cast %265 : vector<16xf32> to vector<16x1xf32>
    %cst_142 = arith.constant 3.200000e+01 : f32
    %267 = vector.broadcast %cst_142 : f32 to vector<16x1xf32>
    %268 = arith.divf %266, %267 : vector<16x1xf32>
    %cst_143 = arith.constant 9.99999974E-6 : f32
    %269 = vector.broadcast %cst_143 : f32 to vector<16x1xf32>
    %270 = arith.addf %268, %269 : vector<16x1xf32>
    %271 = math.rsqrt %270 : vector<16x1xf32>
    %272 = vector.broadcast %271 : vector<16x1xf32> to vector<16x32xf32>
    %273 = arith.mulf %263, %272 : vector<16x32xf32>
    %274 = vector.broadcast %255 : vector<1x32xf32> to vector<16x32xf32>
    %275 = arith.mulf %273, %274 : vector<16x32xf32>
    %276 = vector.broadcast %257 : vector<1x32xf32> to vector<16x32xf32>
    %277 = arith.addf %275, %276 : vector<16x32xf32>
    %c1_144 = arith.constant 1 : index
    %c0_145 = arith.constant 0 : index
    %c0_146 = arith.constant 0 : index
    %278 = vector.load %arg13[%c1_144, %c0_145, %c0_146] : memref<2x32x128xf32, #tpu.memory_space<vmem>>, vector<1x32x128xf32>
    %279 = vector.shape_cast %278 : vector<1x32x128xf32> to vector<32x128xf32>
    %cst_147 = arith.constant dense<0.000000e+00> : vector<16x128xf32>
    %280 = tpu.matmul %277, %279, %cst_147 {dimension_numbers = #tpu.dot_dimension_numbers<[1], [0], [0], [1], [0, 0, 1, 1], [], []>} : vector<16x32xf32>, vector<32x128xf32>, vector<16x128xf32> -> vector<16x128xf32>
    %c1_148 = arith.constant 1 : index
    %c0_149 = arith.constant 0 : index
    %c0_150 = arith.constant 0 : index
    %281 = vector.load %arg14[%c1_148, %c0_149, %c0_150] : memref<2x1x128xf32, #tpu.memory_space<vmem>>, vector<1x1x128xf32>
    %282 = vector.shape_cast %281 : vector<1x1x128xf32> to vector<1x128xf32>
    %283 = vector.broadcast %282 : vector<1x128xf32> to vector<16x128xf32>
    %284 = arith.addf %280, %283 : vector<16x128xf32>
    %cst_151 = arith.constant 5.000000e-01 : f32
    %285 = vector.broadcast %cst_151 : f32 to vector<16x128xf32>
    %286 = arith.mulf %285, %284 : vector<16x128xf32>
    %cst_152 = arith.constant 4.471500e-02 : f32
    %287 = vector.broadcast %cst_152 : f32 to vector<16x128xf32>
    %288 = arith.mulf %287, %284 : vector<16x128xf32>
    %289 = arith.mulf %288, %284 : vector<16x128xf32>
    %290 = arith.mulf %289, %284 : vector<16x128xf32>
    %291 = arith.addf %284, %290 : vector<16x128xf32>
    %cst_153 = arith.constant 0.797884583 : f32
    %292 = vector.broadcast %cst_153 : f32 to vector<16x128xf32>
    %293 = arith.mulf %292, %291 : vector<16x128xf32>
    %294 = math.tanh %293 : vector<16x128xf32>
    %cst_154 = arith.constant 1.000000e+00 : f32
    %295 = vector.broadcast %cst_154 : f32 to vector<16x128xf32>
    %296 = arith.addf %295, %294 : vector<16x128xf32>
    %297 = arith.mulf %286, %296 : vector<16x128xf32>
    %c1_155 = arith.constant 1 : index
    %c0_156 = arith.constant 0 : index
    %c0_157 = arith.constant 0 : index
    %298 = vector.load %arg15[%c1_155, %c0_156, %c0_157] : memref<2x128x32xf32, #tpu.memory_space<vmem>>, vector<1x128x32xf32>
    %299 = vector.shape_cast %298 : vector<1x128x32xf32> to vector<128x32xf32>
    %cst_158 = arith.constant dense<0.000000e+00> : vector<16x32xf32>
    %300 = tpu.matmul %297, %299, %cst_158 {dimension_numbers = #tpu.dot_dimension_numbers<[1], [0], [0], [1], [0, 0, 1, 1], [], []>} : vector<16x128xf32>, vector<128x32xf32>, vector<16x32xf32> -> vector<16x32xf32>
    %c1_159 = arith.constant 1 : index
    %c0_160 = arith.constant 0 : index
    %c0_161 = arith.constant 0 : index
    %301 = vector.load %arg16[%c1_159, %c0_160, %c0_161] : memref<2x1x32xf32, #tpu.memory_space<vmem>>, vector<1x1x32xf32>
    %302 = vector.shape_cast %301 : vector<1x1x32xf32> to vector<1x32xf32>
    %303 = vector.broadcast %302 : vector<1x32xf32> to vector<16x32xf32>
    %304 = arith.addf %300, %303 : vector<16x32xf32>
    %305 = arith.addf %277, %304 : vector<16x32xf32>
    %c1_162 = arith.constant 1 : index
    %c0_163 = arith.constant 0 : index
    %c0_164 = arith.constant 0 : index
    %306 = vector.load %arg17[%c1_162, %c0_163, %c0_164] : memref<2x1x32xf32, #tpu.memory_space<vmem>>, vector<1x1x32xf32>
    %307 = vector.shape_cast %306 : vector<1x1x32xf32> to vector<1x32xf32>
    %c1_165 = arith.constant 1 : index
    %c0_166 = arith.constant 0 : index
    %c0_167 = arith.constant 0 : index
    %308 = vector.load %arg18[%c1_165, %c0_166, %c0_167] : memref<2x1x32xf32, #tpu.memory_space<vmem>>, vector<1x1x32xf32>
    %309 = vector.shape_cast %308 : vector<1x1x32xf32> to vector<1x32xf32>
    %cst_168 = arith.constant dense<0.000000e+00> : vector<16xf32>
    %310 = vector.multi_reduction <add>, %305, %cst_168 [1] : vector<16x32xf32> to vector<16xf32>
    %311 = vector.shape_cast %310 : vector<16xf32> to vector<16x1xf32>
    %cst_169 = arith.constant 3.200000e+01 : f32
    %312 = vector.broadcast %cst_169 : f32 to vector<16x1xf32>
    %313 = arith.divf %311, %312 : vector<16x1xf32>
    %314 = vector.broadcast %313 : vector<16x1xf32> to vector<16x32xf32>
    %315 = arith.subf %305, %314 : vector<16x32xf32>
    %316 = arith.mulf %315, %315 : vector<16x32xf32>
    %cst_170 = arith.constant dense<0.000000e+00> : vector<16xf32>
    %317 = vector.multi_reduction <add>, %316, %cst_170 [1] : vector<16x32xf32> to vector<16xf32>
    %318 = vector.shape_cast %317 : vector<16xf32> to vector<16x1xf32>
    %cst_171 = arith.constant 3.200000e+01 : f32
    %319 = vector.broadcast %cst_171 : f32 to vector<16x1xf32>
    %320 = arith.divf %318, %319 : vector<16x1xf32>
    %cst_172 = arith.constant 9.99999974E-6 : f32
    %321 = vector.broadcast %cst_172 : f32 to vector<16x1xf32>
    %322 = arith.addf %320, %321 : vector<16x1xf32>
    %323 = math.rsqrt %322 : vector<16x1xf32>
    %324 = vector.broadcast %323 : vector<16x1xf32> to vector<16x32xf32>
    %325 = arith.mulf %315, %324 : vector<16x32xf32>
    %326 = vector.broadcast %307 : vector<1x32xf32> to vector<16x32xf32>
    %327 = arith.mulf %325, %326 : vector<16x32xf32>
    %328 = vector.broadcast %309 : vector<1x32xf32> to vector<16x32xf32>
    %329 = arith.addf %327, %328 : vector<16x32xf32>
    %330 = vector.shape_cast %329 : vector<16x32xf32> to vector<2x8x32xf32>
    %cst_173 = arith.constant dense<0.000000e+00> : vector<2x32xf32>
    %331 = vector.multi_reduction <add>, %330, %cst_173 [1] : vector<2x8x32xf32> to vector<2x32xf32>
    %cst_174 = arith.constant 8.000000e+00 : f32
    %332 = vector.broadcast %cst_174 : f32 to vector<2x32xf32>
    %333 = arith.divf %331, %332 : vector<2x32xf32>
    %334 = vector.shape_cast %333 : vector<2x32xf32> to vector<1x2x32xf32>
    %c0_175 = arith.constant 0 : index
    %c0_176 = arith.constant 0 : index
    %c0_177 = arith.constant 0 : index
    %335 = vector.load %arg19[%c0_175, %c0_176, %c0_177] : memref<1x2x32xf32, #tpu.memory_space<vmem>>, vector<1x2x32xf32>
    tpu.vector_store %arg19[%c0_175, %c0_176, %c0_177], %334 {strides = array<i32>} : memref<1x2x32xf32, #tpu.memory_space<vmem>>, vector<1x2x32xf32>,
    return
  }
  func.func @transform_0(%arg0: i32) -> (i32, i32, i32) {
    %c0_i32 = arith.constant 0 : i32
    %c0_i32_0 = arith.constant 0 : i32
    %c0_i32_1 = arith.constant 0 : i32
    return %arg0, %c0_i32, %c0_i32_0 : i32, i32, i32
  }
  func.func @transform_1(%arg0: i32) -> (i32, i32, i32) {
    %c0_i32 = arith.constant 0 : i32
    %c0_i32_0 = arith.constant 0 : i32
    %c0_i32_1 = arith.constant 0 : i32
    return %arg0, %c0_i32, %c0_i32_0 : i32, i32, i32
  }
  func.func @transform_2(%arg0: i32) -> (i32, i32) {
    %c0_i32 = arith.constant 0 : i32
    %c0_i32_0 = arith.constant 0 : i32
    %c0_i32_1 = arith.constant 0 : i32
    return %c0_i32, %c0_i32_0 : i32, i32
  }
  func.func @transform_3(%arg0: i32) -> (i32, i32, i32) {
    %c0_i32 = arith.constant 0 : i32
    %c0_i32_0 = arith.constant 0 : i32
    %c0_i32_1 = arith.constant 0 : i32
    %c0_i32_2 = arith.constant 0 : i32
    return %c0_i32, %c0_i32_0, %c0_i32_1 : i32, i32, i32
  }
  func.func @transform_4(%arg0: i32) -> (i32, i32, i32) {
    %c0_i32 = arith.constant 0 : i32
    %c0_i32_0 = arith.constant 0 : i32
    %c0_i32_1 = arith.constant 0 : i32
    %c0_i32_2 = arith.constant 0 : i32
    return %c0_i32, %c0_i32_0, %c0_i32_1 : i32, i32, i32
  }
  func.func @transform_5(%arg0: i32) -> (i32, i32, i32) {
    %c0_i32 = arith.constant 0 : i32
    %c0_i32_0 = arith.constant 0 : i32
    %c0_i32_1 = arith.constant 0 : i32
    %c0_i32_2 = arith.constant 0 : i32
    return %c0_i32, %c0_i32_0, %c0_i32_1 : i32, i32, i32
  }
  func.func @transform_6(%arg0: i32) -> (i32, i32, i32) {
    %c0_i32 = arith.constant 0 : i32
    %c0_i32_0 = arith.constant 0 : i32
    %c0_i32_1 = arith.constant 0 : i32
    %c0_i32_2 = arith.constant 0 : i32
    return %c0_i32, %c0_i32_0, %c0_i32_1 : i32, i32, i32
  }
  func.func @transform_7(%arg0: i32) -> (i32, i32, i32) {
    %c0_i32 = arith.constant 0 : i32
    %c0_i32_0 = arith.constant 0 : i32
    %c0_i32_1 = arith.constant 0 : i32
    %c0_i32_2 = arith.constant 0 : i32
    return %c0_i32, %c0_i32_0, %c0_i32_1 : i32, i32, i32
  }
  func.func @transform_8(%arg0: i32) -> (i32, i32, i32) {
    %c0_i32 = arith.constant 0 : i32
    %c0_i32_0 = arith.constant 0 : i32
    %c0_i32_1 = arith.constant 0 : i32
    %c0_i32_2 = arith.constant 0 : i32
    return %c0_i32, %c0_i32_0, %c0_i32_1 : i32, i32, i32
  }
  func.func @transform_9(%arg0: i32) -> (i32, i32, i32) {
    %c0_i32 = arith.constant 0 : i32
    %c0_i32_0 = arith.constant 0 : i32
    %c0_i32_1 = arith.constant 0 : i32
    %c0_i32_2 = arith.constant 0 : i32
    return %c0_i32, %c0_i32_0, %c0_i32_1 : i32, i32, i32
  }
  func.func @transform_10(%arg0: i32) -> (i32, i32, i32) {
    %c0_i32 = arith.constant 0 : i32
    %c0_i32_0 = arith.constant 0 : i32
    %c0_i32_1 = arith.constant 0 : i32
    %c0_i32_2 = arith.constant 0 : i32
    return %c0_i32, %c0_i32_0, %c0_i32_1 : i32, i32, i32
  }
  func.func @transform_11(%arg0: i32) -> (i32, i32, i32) {
    %c0_i32 = arith.constant 0 : i32
    %c0_i32_0 = arith.constant 0 : i32
    %c0_i32_1 = arith.constant 0 : i32
    %c0_i32_2 = arith.constant 0 : i32
    return %c0_i32, %c0_i32_0, %c0_i32_1 : i32, i32, i32
  }
  func.func @transform_12(%arg0: i32) -> (i32, i32, i32) {
    %c0_i32 = arith.constant 0 : i32
    %c0_i32_0 = arith.constant 0 : i32
    %c0_i32_1 = arith.constant 0 : i32
    %c0_i32_2 = arith.constant 0 : i32
    return %c0_i32, %c0_i32_0, %c0_i32_1 : i32, i32, i32
  }
  func.func @transform_13(%arg0: i32) -> (i32, i32, i32) {
    %c0_i32 = arith.constant 0 : i32
    %c0_i32_0 = arith.constant 0 : i32
    %c0_i32_1 = arith.constant 0 : i32
    %c0_i32_2 = arith.constant 0 : i32
    return %c0_i32, %c0_i32_0, %c0_i32_1 : i32, i32, i32
  }
  func.func @transform_14(%arg0: i32) -> (i32, i32, i32) {
    %c0_i32 = arith.constant 0 : i32
    %c0_i32_0 = arith.constant 0 : i32
    %c0_i32_1 = arith.constant 0 : i32
    %c0_i32_2 = arith.constant 0 : i32
    return %c0_i32, %c0_i32_0, %c0_i32_1 : i32, i32, i32
  }
  func.func @transform_15(%arg0: i32) -> (i32, i32, i32) {
    %c0_i32 = arith.constant 0 : i32
    %c0_i32_0 = arith.constant 0 : i32
    %c0_i32_1 = arith.constant 0 : i32
    %c0_i32_2 = arith.constant 0 : i32
    return %c0_i32, %c0_i32_0, %c0_i32_1 : i32, i32, i32
  }
  func.func @transform_16(%arg0: i32) -> (i32, i32, i32) {
    %c0_i32 = arith.constant 0 : i32
    %c0_i32_0 = arith.constant 0 : i32
    %c0_i32_1 = arith.constant 0 : i32
    %c0_i32_2 = arith.constant 0 : i32
    return %c0_i32, %c0_i32_0, %c0_i32_1 : i32, i32, i32
  }
  func.func @transform_17(%arg0: i32) -> (i32, i32, i32) {
    %c0_i32 = arith.constant 0 : i32
    %c0_i32_0 = arith.constant 0 : i32
    %c0_i32_1 = arith.constant 0 : i32
    %c0_i32_2 = arith.constant 0 : i32
    return %c0_i32, %c0_i32_0, %c0_i32_1 : i32, i32, i32
  }
  func.func @transform_18(%arg0: i32) -> (i32, i32, i32) {
    %c0_i32 = arith.constant 0 : i32
    %c0_i32_0 = arith.constant 0 : i32
    %c0_i32_1 = arith.constant 0 : i32
    return %arg0, %c0_i32, %c0_i32_0 : i32, i32, i32
  }
}

</mosaic_0001>

<bundles_post_ra>
// kernel: tpu_custom_call.1
= control target key start
LH: loop header
LB: loop body
LE: loop exit
PB: predicated region body
PF: predicated region fallthrough
CT: control target
= control target key end

     0   :  { %s6893_s0 = inlined_call_operand.hbm [shape: f32[4,8,32], index: 0, kind: input, shape index: {}]   ;;  %s6894_s1 = inlined_call_operand.vmem [shape: f32[4,16,32], index: 1, kind: input, shape index: {}]   ;;  %s6895_s2 = inlined_call_operand.hbm [shape: f32[8,32], index: 2, kind: input, shape index: {}]   ;;  %s6896_s3 = inlined_call_operand.vmem [shape: f32[4,1,32], index: 3, kind: input, shape index: {}]   ;;  %s6897_s4 = inlined_call_operand.vmem [shape: f32[2,32,32], index: 4, kind: input, shape index: {}]   ;;  %s6898_s5 = inlined_call_operand.vmem [shape: f32[2,1,32], index: 5, kind: input, shape index: {}]   ;;  %s6899_s6 = inlined_call_operand.vmem [shape: f32[2,32,32], index: 6, kind: input, shape index: {}]   ;;  %s6900_s7 = inlined_call_operand.vmem [shape: f32[2,1,32], index: 7, kind: input, shape index: {}]   ;;  %s6901_s8 = inlined_call_operand.vmem [shape: f32[2,32,32], index: 8, kind: input, shape index: {}]   ;;  %s6902_s9 = inlined_call_operand.vmem [shape: f32[2,1,32], index: 9, kind: input, shape index: {}]   ;;  %s6903_s10 = inlined_call_operand.vmem [shape: f32[2,1,32], index: 10, kind: input, shape index: {}]   ;;  %s6904_s11 = inlined_call_operand.vmem [shape: f32[2,1,32], index: 11, kind: input, shape index: {}]   ;;  %s6905_s12 = inlined_call_operand.vmem [shape: f32[2,32,128], index: 12, kind: input, shape index: {}]   ;;  %s6906_s13 = inlined_call_operand.vmem [shape: f32[2,1,128], index: 13, kind: input, shape index: {}]   ;;  %s6907_s14 = inlined_call_operand.vmem [shape: f32[2,128,32], index: 14, kind: input, shape index: {}]   ;;  %s6908_s15 = inlined_call_operand.vmem [shape: f32[2,1,32], index: 15, kind: input, shape index: {}]   ;;  %s6909_s16 = inlined_call_operand.vmem [shape: f32[2,1,32], index: 16, kind: input, shape index: {}]   ;;  %s6910_s17 = inlined_call_operand.vmem [shape: f32[2,1,32], index: 17, kind: input, shape index: {}]   ;;  %s6911_s18 = inlined_call_operand.hbm [shape: f32[2,2,32], index: 18, kind: output, shape index: {}]  }
   0x1   :  { %6933 = sst [smem:[#allocation17_spill]] %s6893_s0 }
   0x2   :  { %6934 = sst [smem:[#allocation18_spill]] %s6894_s1 }
   0x3   :  { %6935 = sst [smem:[#allocation19_spill]] %s6895_s2 }
   0x4   :  { %6936 = sst [smem:[#allocation20_spill]] %s6896_s3 }
   0x5   :  { %6937 = sst [smem:[#allocation21_spill]] %s6904_s11 }
   0x6   :  { %6938 = sst [smem:[#allocation22_spill]] %s6906_s13 }
   0x7   :  { %6939 = sst [smem:[#allocation23_spill]] %s6908_s15 }
   0x8   :  { %6940 = sst [smem:[#allocation24_spill]] %s6909_s16 }
   0x9   :  { %6941 = sst [smem:[#allocation25_spill]] %s6910_s17 }
   0xa   :  { %6942 = sst [smem:[#allocation26_spill]] %s6911_s18 }
   0xb   :  { %23 = vsyncpa [#allocation3], 0 }
   0xc   :  { %25 = vsyncpa [#allocation3 + $0x1], 0 }
   0xd   :  { %26 = vsyncpa [#allocation6], 0 }
   0xe   :  { %27 = vsyncpa [#allocation4], 0 }
   0xf   :  { %29 = vsyncpa [#allocation4 + $0x1], 0  ;;  %s5967_s27 = smov 0   ;;  %s5969_s28 = smov 0  }
  0x10   :  { %s5971_s29 = smov 0   ;;  %s5973_s30 = smov 0  }
  0x11 LB: > { %6943 = sst [smem:[#allocation11_spill]] %s5850_s27  ;;  %s5988_s0 = sadd.s32 4294967295, %s5862_s30   ;;  %s5862_s30 = sphi %s5973_s30, %s6981_s30   ;;  %s5858_s29 = sphi %s5971_s29, %s6983_s29   ;;  %s5854_s28 = sphi %s5969_s28, %s6985_s28   ;;  %s5850_s27 = sphi %s5967_s27, %s6984_s27  }
  0x12   : > { %6944 = sst [smem:[#allocation12_spill]] %s5858_s29  ;;  %s4556_s19 = sadd.s32 4294967294, %s5862_s30  }
  0x13   : > { %s5992_s1 = sadd.s32 1, %s5862_s30   ;;  %s42_s20 = sadd.s32 1, %s5858_s29 }
  0x14   : > { %6945 = sst [smem:[#allocation13_spill]] %s5992_s1  ;;  %s39_s21 = ssub.s32 %s5862_s30, %s5992_s1 }
  0x15   : > { %p49_p0 = scmp.ne.s32.totalorder %s5858_s29, %s5854_s28  ;;  %p40_p1 = scmp.eq.s32.totalorder %s39_s21, 0 }
  0x16   : > { %p50_p2 = scmp.eq.s32.totalorder %s5862_s30, 0  ;;  %p55_p3 = scmp.ne.s32.totalorder %s5854_s28, %s5850_s27 }
  0x17   : > { %p6914_p4 = scmp.eq.s32.totalorder %s5988_s0, 0  ;;  %p441_p7 = scmp.eq.s32.totalorder %s5988_s0, 1 }
  0x18   : > { %s6004_s22 = scalar_select %p40_p1, %s5858_s29, %s42_s20  }
  0x19   : > { %p6006_p5 = por %p50_p2, %p49_p0  ;;  %p6012_p6 = por %p6914_p4, %p55_p3 }
  0x1a   : > { %6946 = sst [smem:[#allocation14_spill]] %s6004_s22  ;;  %p447_p8 = scmp.eq.s32.totalorder %s4556_s19, 1 }
  0x1b   : > { %s6948_s23 = scalar_select %p6012_p6, 1, 0 }
  0x1c   : > { %p4557_p9 = scmp.ge.s32.totalorder %s5862_s30, 1  ;;  %p454_p10 = scmp.lt.s32.totalorder %s5862_s30, 3 }
  0x1d   : > { %p6019_p11 = por %p441_p7, %p49_p0  ;;  %p6023_p12 = por %p447_p8, %p55_p3 }
  0x1e   : > { %p6027_p13 = pnand %p4557_p9, %p454_p10  ;;  %s5864_s20 = smov [#allocation5]  }
  0x1f   : > { %s6949_s24 = scalar_select %p6019_p11, 1, 0 }
  0x20   : > { %s6951_s25 = scalar_select %p6023_p12, 1, 0 }
  0x21   : > { %6950 = sst [smem:[#allocation15_spill]] %s6949_s24  ;;  %p5591_p2 = pneg %p6027_p13 }
  0x22   : > { %6952 = sst [smem:[#allocation16_spill]] %s6951_s25  ;;  %s467_s19 = sshll.u32 %s5864_s20, 4  ;;  %s468_s19 = int_to_ptr.vmem [resolvable:$true] %s467_s19 }
  0x23   : > { %s6953_s26 = scalar_select %p6027_p13, 1, 0 }
  0x24   : > { %p5604_p4 = scmp.lt.s32.totalorder %s5862_s30, 2  ;;  %p6954_p0 = scmp.eq.s32.totalorder %s5988_s0, 0 }
  0x25   : > { %s523_s22 = sand.u32 1, %s5858_s29   ;;  %s6957_s24 = sld [smem:[#allocation19_spill]] }
  0x26   : > { %p6037_p7 = pnand %p5591_p2, %p6954_p0  ;;  %p6044_p3 = pnand %p5604_p4, %p6006_p5 }
  0x27   : > { %s4560_s25 = sshll.u32 %s523_s22, 4 }
  0x28   : > { %s6956_s1 = scalar_select %p6044_p3, 1, 0 }
  0x29   : > { %p5736_p9 = pneg %p6037_p7 }
  0x2b   : > { %s5734_s17 = scalar_lea.hbm %s6957_s24, 128 }
  0x2c   : > { %p5735_p8 = scmp.ne.s32.totalorder %s6957_s24, %s5734_s17  ;;  %p5741_p4 = scmp.lt.u32.totalorder %s5734_s17, %s6957_s24 }
  0x2e   : > { %p5737_p10 = pnand %p5736_p9, %p5735_p8 }
  0x30   : > { %p5738_p2 = pneg %p5737_p10 }
  0x32   : > { %p5743_p5 = pnand %p5741_p4, %p5738_p2 }
  0x34   : > { %5746 = shalt.err (!%p5743_p5)
}
  0x35   : > { %s5747_s2 = scalar_lea.vmem %s468_s19, 128  ;;  %p5755_p11 = scmp.lt.s32.totalorder %s468_s19, %s468_s19 }
  0x36   : > { %p5748_p0 = scmp.ne.s32.totalorder %s468_s19, %s5747_s2  ;;  %p5756_p6 = scmp.lt.s32.totalorder %s5747_s2, %s5747_s2 }
  0x38   : > { %p5750_p1 = pnand %p5748_p0, %p5736_p9  ;;  %p5757_p13 = por %p5756_p6, %p5755_p11 }
  0x3a   : > { %p5751_p12 = pneg %p5750_p1 }
  0x3c   : > { %p5758_p3 = pnand %p5757_p13, %p5751_p12 }
  0x3e   : > { %5761 = shalt.err (!%p5758_p3)
}
  0x3f   : > { %5594 = dma.hbm_to_vmem [thread:$0]  (!%p6037_p7), %s6957_s24, 128, %s468_s19, [#allocation6]  }
  0x40   : > { %s4735_s15 = sshll.u32 %s5862_s30, 8  ;;  %s527_s17 = scalar_lea.vmem [#allocation2], %s4560_s25 }
  0x41   : > { %s534_s27 = sshll.u32 %s527_s17, 4  ;;  %s6958_s13 = sld [smem:[#allocation17_spill]]  ;;  %s6070_s27 = int_to_ptr.vmem [resolvable:$true] %s534_s27 }
  0x42   : > { %s6072_s21 = scalar_lea.sflag [#allocation3], %s523_s22  ;;  %p6959_p11 = scmp.ne.s32.totalorder %s6956_s1, 0 }
  0x44   : > { %p5764_p12 = pneg %p6959_p11 }
  0x47   : > { %s6068_s11 = scalar_lea.hbm %s6958_s13, %s4735_s15  ;;  %s5767_s16 = scalar_lea.hbm %s6958_s13, 512 }
  0x48   : > { %s5762_s2 = scalar_lea.hbm %s6068_s11, 256  ;;  %p5768_p7 = scmp.lt.u32.totalorder %s6068_s11, %s6958_s13 }
  0x49   : > { %p5763_p6 = scmp.ne.s32.totalorder %s6068_s11, %s5762_s2  ;;  %p5769_p3 = scmp.lt.u32.totalorder %s5767_s16, %s5762_s2 }
  0x4a   : > { %p5771_p9 = scmp.lt.u32.totalorder %s5762_s2, %s6068_s11 }
  0x4b   : > { %p5765_p13 = pnand %p5764_p12, %p5763_p6  ;;  %p5770_p8 = por %p5769_p3, %p5768_p7 }
  0x4d   : > { %p5766_p1 = pneg %p5765_p13  ;;  %p5772_p10 = por %p5771_p9, %p5770_p8 }
  0x4f   : > { %p5773_p2 = pnand %p5772_p10, %p5766_p1 }
  0x51   : > { %5776 = shalt.err (!%p5773_p2)
}
  0x52   : > { %s5777_s22 = scalar_lea.vmem %s6070_s27, 256  ;;  %s5865_s17 = smov [#allocation2]  }
  0x53   : > { %p5778_p4 = scmp.ne.s32.totalorder %s6070_s27, %s5777_s22  ;;  %s5782_s29 = sshll.u32 %s5865_s17, 4  ;;  %s5783_s29 = int_to_ptr.vmem [resolvable:$false] %s5782_s29 }
  0x54   : > { %s5784_s20 = scalar_lea.vmem %s5783_s29, 512  ;;  %p5785_p6 = scmp.lt.s32.totalorder %s6070_s27, %s5783_s29 }
  0x55   : > { %p5780_p5 = pnand %p5778_p4, %p5764_p12  ;;  %p5786_p13 = scmp.lt.s32.totalorder %s5784_s20, %s5777_s22 }
  0x57   : > { %p5781_p0 = pneg %p5780_p5  ;;  %p5787_p7 = por %p5786_p13, %p5785_p6 }
  0x59   : > { %p5788_p3 = pnand %p5787_p7, %p5781_p0 }
  0x5b   : > { %5791 = shalt.err (!%p5788_p3)
}
  0x5c   : > { %s5866_s2 = smov 128   ;;  %s5867_s25 = smov 8  }
  0x5d   : > { %5598 = dma.hbm_to_vmem [thread:$0]  (!%p6959_p11), %s6068_s11, 256, %s6070_s27, %s6072_s21, %s5866_s2, %s5866_s2, %s5867_s25  }
  0x5e   : > { %p6960_p12 = scmp.ne.s32.totalorder %s6953_s26, 0 }
  0x5f   : > { %s6103_s19 = sand.u32 (!%p6960_p12), 1, %s5854_s28   ;;  %p6961_p1 = scmp.ne.s32.totalorder (!%p6960_p12), %s6948_s23, 0 }
  0x60   : > { %556 = sbr.rel (%p6960_p12) target bundleno = 5770 (0x168a), region = 92  ;;  %s4564_s16 = sshll.u32 (!%p6960_p12), %s6103_s19, 4 }
  0x61   : > { %s559_s18 = scalar_lea.sflag (!%p6960_p12), [#allocation3], %s6103_s19  ;;  %s6107_s15 = scalar_lea.vmem (!%p6960_p12), [#allocation2], %s4564_s16 }
  0x67   : > { %5837 = dma.done.wait (%p6961_p1), %s559_s18, 256  }
  0x68   : > { %5839 = vsyncadd (%p6961_p1), %s559_s18, 4294967040  ;;  %p6962_p11 = scmp.eq.s32.totalorder %s5988_s0, 0 }
  0x6a   : > { %5841 = dma.done.wait (%p6962_p11), [#allocation6], 128   ;;  %p6963_p8 = pmov %p6962_p11 }
  0x6b   : > { %s4567_s11 = sshll.u32 %s5988_s0, 1  ;;  %s6964_s21 = sld [smem:[#allocation18_spill]]  ;;  %vm653_vm0 = vcmask 261120   ;;  %v642_v0 = vld [vmem:[%s6897_s4] sm:$0xff]  ;;  %v643_v1 = vld [vmem:[%s6897_s4 + $0x8] sm:$0xff]  ;;  %v644_v2 = vld [vmem:[%s6897_s4 + $0x10] sm:$0xff] }
  0x6c   : > { %5843 = vsyncadd (%p6963_p8), [#allocation6], 4294967168  ;;  %p627_p9 = scmp.lt.s32.totalorder %s4567_s11, 3  ;;  %v5319_v3 = vpack.c.bf16 %v643_v1, %v642_v0  ;;  %v645_v4 = vld [vmem:[%s6897_s4 + $0x18] sm:$0xff]  ;;  %v751_v7 = vld [vmem:[%s6899_s6] sm:$0xff]  ;;  %v5868_v16 = vmov 0.0|0.0  }
  0x6d   : > { %v5323_v6 = vpack.c.bf16 %v645_v4, %v644_v2  ;;  %v752_v8 = vld [vmem:[%s6899_s6 + $0x8] sm:$0xff]  ;;  %v753_v10 = vld [vmem:[%s6899_s6 + $0x10] sm:$0xff]  ;;  %v754_v11 = vld [vmem:[%s6899_s6 + $0x18] sm:$0xff]  ;;  %5343 = vmatprep.subr.bf16.mxu0 %v5868_v16  ;;  %vm5869_vm1 = vmmov 0   ;;  %v5870_v17 = vmov 0.0   ;;  %s6967_s3 = sld [smem:[#allocation20_spill]] }
  0x6e   : > { %s6987_s11 = smov (!%p627_p9, %s4567_s11), 3  ;;  %5320 = vmatprep.subr.bf16.mxu1 %v5319_v3  ;;  %v5327_v9 = vpack.c.bf16 %v752_v8, %v751_v7  ;;  %v5331_v14 = vpack.c.bf16 %v754_v11, %v753_v10  ;;  %4971 = vmatprep.mubr.msk.f32.mxu0 %vm5869_vm1, %v5870_v17  ;;  %v4570_v18 = vld [vmem:[%s6898_s5] ss:$0 sm:$0xff]  ;;  %vm6181_vm2 = vmpackc.low %vm653_vm0, %vm653_vm0  ;;  %v634_v39 = vld [vmem:[%s6107_s15 + $0x8] sm:$0xff]  ;;  %vm1018_vm3 = vcmask 130048   ;;  %s6971_s26 = sld [smem:[#allocation24_spill]] }
  0x6f   : > { %s4736_s1 = sshll.u32 %s6987_s11, 4  ;;  %5322 = vmatpush3.bf16.msra.mxu1 %v5319_v3  ;;  %v633_v23 = vld [vmem:[%s6107_s15] sm:$0xff]  ;;  %s6970_s11 = sld [smem:[#allocation23_spill]]  ;;  %vm4445_vm4 = vcmask 1041409   ;;  %vm4448_vm5 = vcmask 254976  }
  0x70   : > { %5324 = vmatprep.subr.bf16.mxu1 %v5323_v6  ;;  %v635_v24 = vld [vmem:[#allocation5] sm:$0xff]  ;;  %s6972_s29 = sld [smem:[#allocation25_spill]]  ;;  %s4566_s15 = sshll.u32 %s6103_s19, 1 }
  0x71   : > { %s631_s22 = scalar_lea.vmem %s6964_s21, %s4736_s1  ;;  %v6187_v30 = vadd.f32 %v635_v24, %v633_v23  ;;  %v6216_v41 = vadd.f32 %v635_v24, %v634_v39  ;;  %v4575_v45 = vld [vmem:[%s6900_s7] ss:$0 sm:$0xff]  ;;  %s6968_s1 = sld [smem:[#allocation21_spill]] }
  0x72   : > { %v6133_v5 = vld [vmem:[%s631_s22] sm:$0xff]  ;;  %v6149_v12 = vld [vmem:[%s631_s22 + $0x8] sm:$0xff]  ;;  %v6151_v13 = vld [vmem:[%s631_s22 + $0x10] sm:$0xff]  ;;  %s6969_s21 = sld [smem:[#allocation22_spill]]  ;;  %s6974_s27 = sld [smem:[#allocation15_spill]] }
  0x73   : > { %4933 = vmatprep.mubr.msk.f32.mxu1 %vm653_vm0, %v6133_v5  ;;  %5326 = vmatpush3.bf16.msra.mxu1 %v5323_v6  ;;  %v6157_v15 = vld [vmem:[%s631_s22 + $0x18] sm:$0xff]  ;;  %v6198_v32 = vld [vmem:[%s6967_s3] ss:$0 sm:$0xff]  ;;  %v6203_v33 = vld [vmem:[%s6967_s3 + $0x1] ss:$0 sm:$0xff]  ;;  %s4732_s17 = sshll.u32 %s5988_s0, 5 }
  0x74   : > { %5328 = vmatprep.subr.bf16.mxu1 %v5327_v9  ;;  %v854_v36 = vmul.f32 %v6198_v32, %v6187_v30  ;;  %v1041_v37 = vmul.f32 %v6203_v33, %v6187_v30  ;;  %v855_v43 = vmul.f32 %v6198_v32, %v6216_v41  ;;  %v1042_v44 = vmul.f32 %v6203_v33, %v6216_v41  ;;  %v6246_v48 = vld [vmem:[%s6967_s3 + $0x2] ss:$0 sm:$0xff]  ;;  %v6254_v50 = vld [vmem:[%s6967_s3 + $0x3] ss:$0 sm:$0xff]  ;;  %s6975_s25 = sld [smem:[#allocation26_spill]]  ;;  %s4451_s18 = scalar_lea.sflag [#allocation4], %s6103_s19 }
  0x76   : > { %4934 = vmatmul.mubr.msk.f32.vlgmr.msra.gmra.mrb[0].mxu1 %vm653_vm0, %v6149_v12  ;;  %s6973_s23 = smov %s6972_s29 }
  0x77   : > { %4936 = vmatprep.mubr.msk.f32.mxu1 %vm653_vm0, %v6151_v13  ;;  %5330 = vmatpush3.bf16.msra.mxu1 %v5327_v9 }
  0x78   : > { %5332 = vmatprep.subr.bf16.mxu1 %v5331_v14  ;;  %p6976_p2 = scmp.ne.s32.totalorder %s6974_s27, 0 }
  0x7a   : > { %4937 = vmatmul.mubr.msk.f32.gmra.mrb[2].mxu1 %vm653_vm0, %v6157_v15  ;;  %s6849_s16 = scalar_lea.hbm %s6975_s25, %s4732_s17 }
  0x7b   : > { %5334 = vmatpush3.bf16.msra.mxu1 %v5331_v14  ;;  %4947 = vmatprep.mubr.msk.f32.mxu1 %vm653_vm0, %v6133_v5 }
  0x7c   : > { %5335 = vmatprep.subr.bf16.mxu1 %v5868_v16 }
  0x7e   : > { %4948 = vmatmul.mubr.msk.f32.vlgmr.msra.gmra.mrb[4].mxu1 %vm653_vm0, %v6149_v12 }
  0x7f   : > { %4950 = vmatprep.mubr.msk.f32.mxu1 %vm653_vm0, %v6151_v13 }
  0x82   : > { %4951 = vmatmul.mubr.msk.f32.gmra.mrb[6].mxu1 %vm653_vm0, %v6157_v15 }
  0x83   : > { %4957 = vmatprep.mubr.msk.f32.mxu1 %vm5869_vm1, %v5870_v17 }
 0x149   : > { %v4935_v19 = vpop.f32.mrb[0].mxu1 }
 0x14a   : > { %v738_v20 = vadd.f32 %v4935_v19, %v4570_v18  ;;  %v732_v21 = vpop.f32.mrb[1].mxu1 }
 0x14b   : > { %v733_v22 = vadd.f32 %v4570_v18, %v732_v21 }
 0x14d   : > { %v6185_v26 = vpack.c.bf16 %v738_v20, %v733_v22  ;;  %v4938_v27 = vpop.f32.mrb[2].mxu1 }
 0x14e   : > { %v748_v28 = vadd.f32 %v4938_v27, %v4570_v18  ;;  %v742_v29 = vpop.f32.mrb[3].mxu1 }
 0x14f   : > { %5338 = vmatpush3.bf16.xpose.msk.msra.mxu1 %vm6181_vm2, %v6185_v26  ;;  %5346 = vmatpush3.bf16.xpose.msk.msra.mxu0 %vm6181_vm2, %v6185_v26  ;;  %v743_v31 = vadd.f32 %v4570_v18, %v742_v29 }
 0x150   : > { %5339 = vmatprep.subr.bf16.mxu1 %v5868_v16  ;;  %5351 = vmatprep.subr.bf16.mxu0 %v5868_v16 }
 0x151   : > { %v6207_v34 = vpack.c.bf16 %v748_v28, %v743_v31  ;;  %v4949_v35 = vpop.f32.mrb[4].mxu1 }
 0x152   : > { %v828_v38 = vpop.f32.mrb[5].mxu1  ;;  %v834_v46 = vadd.f32 %v4949_v35, %v4575_v45 }
 0x153   : > { %v829_v47 = vadd.f32 %v4575_v45, %v828_v38 }
 0x154   : > { %v6249_v49 = vmul.f32 %v6198_v32, %v834_v46  ;;  %v1204_v52 = vmul.f32 %v6203_v33, %v834_v46  ;;  %v6262_v56 = vmul.f32 %v6246_v48, %v834_v46  ;;  %v6268_v58 = vmul.f32 %v6254_v50, %v834_v46 }
 0x155   : > { %v4952_v40 = vpop.f32.mrb[6].mxu1  ;;  %v6258_v53 = vmul.f32 %v6198_v32, %v829_v47  ;;  %v1203_v54 = vmul.f32 %v6203_v33, %v829_v47  ;;  %v6265_v57 = vmul.f32 %v6246_v48, %v829_v47  ;;  %v6271_v59 = vmul.f32 %v6254_v50, %v829_v47 }
 0x156   : > { %4958 = vmatmul.mubr.msk.f32.vlgmr.msra.gmra.mrb[8].mxu1 %vm653_vm0, %v854_v36  ;;  %4972 = vmatmul.mubr.msk.f32.vlgmr.msra.gmra.mrb[0].mxu0 %vm653_vm0, %v1041_v37  ;;  %v838_v42 = vpop.f32.mrb[7].mxu1  ;;  %v844_v51 = vadd.f32 %v4952_v40, %v4575_v45 }
 0x157   : > { %5342 = vmatpush3.bf16.xpose.msk.msra.mxu1 %vm6181_vm2, %v6207_v34  ;;  %4964 = vmatprep.mubr.msk.f32.mxu1 %vm5869_vm1, %v5870_v17  ;;  %v839_v55 = vadd.f32 %v4575_v45, %v838_v42  ;;  %v5352_v63 = vpack.c.bf16 %v1204_v52, %v1203_v54  ;;  %v5358_v0 = vpack.c.bf16 %v6249_v49, %v6258_v53 }
 0x158   : > { %5347 = vmatprep.subr.bf16.mxu1 %v5868_v16  ;;  %4985 = vmatprep.mubr.msk.f32.mxu0 %vm5869_vm1, %v5870_v17  ;;  %v6274_v60 = vmul.f32 %v6198_v32, %v844_v51  ;;  %v1206_v61 = vmul.f32 %v6203_v33, %v844_v51  ;;  %v6281_v1 = vmul.f32 %v6246_v48, %v844_v51 }
 0x159   : > { %v1205_v62 = vmul.f32 %v6203_v33, %v839_v55  ;;  %v6284_v2 = vmul.f32 %v6198_v32, %v839_v55  ;;  %v6287_v3 = vmul.f32 %v6246_v48, %v839_v55  ;;  %v5372_v4 = vpack.c.bf16 %v6262_v56, %v6265_v57  ;;  %5353 = vmatpush3.bf16.msra.mxu0 %v5352_v63 }
 0x15a   : > { %v6292_v6 = vmul.f32 %v6254_v50, %v844_v51  ;;  %v6295_v7 = vmul.f32 %v6254_v50, %v839_v55  ;;  %v5386_v8 = vpack.c.bf16 %v6268_v58, %v6271_v59  ;;  %5357 = vmatprep.subr.bf16.mxu0 %v5868_v16  ;;  %v1508_v56 = vmul.f32 %v6246_v48, %v6216_v41 }
 0x15b   : > { %v5355_v9 = vpack.c.bf16 %v1206_v61, %v1205_v62  ;;  %v5361_v10 = vpack.c.bf16 %v6274_v60, %v6284_v2  ;;  %v5375_v11 = vpack.c.bf16 %v6281_v1, %v6287_v3  ;;  %v1507_v61 = vmul.f32 %v6246_v48, %v6187_v30 }
 0x15c   : > { %v5389_v14 = vpack.c.bf16 %v6292_v6, %v6295_v7  ;;  %v1830_v58 = vmul.f32 %v6254_v50, %v6216_v41 }
 0x15e   : > { %4965 = vmatmul.mubr.msk.f32.vlgmr.msra.gmra.mrb[10].mxu1 %vm653_vm0, %v855_v43 }
 0x15f   : > { %5350 = vmatpush3.bf16.xpose.msk.msra.mxu1 %vm6181_vm2, %v6207_v34  ;;  %4978 = vmatprep.mubr.msk.f32.mxu1 %vm5869_vm1, %v5870_v17 }
 0x160   : > { %5354 = vmatprep.subr.bf16.mxu1 %v5868_v16 }
 0x166   : > { %4979 = vmatmul.mubr.msk.f32.vlgmr.msra.gmra.mrb[12].mxu1 %vm653_vm0, %v1042_v44 }
 0x167   : > { %4992 = vmatprep.mubr.msk.f32.mxu1 %vm5869_vm1, %v5870_v17  ;;  %5356 = vmatpush3.bf16.msra.mxu1 %v5355_v9 }
 0x168   : > { %5360 = vmatprep.subr.bf16.mxu1 %v5868_v16 }
 0x229   : > { %v931_v18 = vpop.f32.mrb[8].mxu1  ;;  %v1112_v19 = vpop.f32.mrb[0].mxu0 }
 0x22a   : > { %v1014_v20 = vmul.f32 1.442695, %v931_v18  ;;  %v1189_v21 = vmul.f32 1.442695, %v1112_v19  ;;  %v4959_v22 = vpop.f32.mrb[9].mxu1  ;;  %v4973_v23 = vpop.f32.mrb[1].mxu0 }
 0x22b   : > { %v1829_v23 = vmul.f32 %v6254_v50, %v6187_v30 }
 0x22c   : > { %5645 = vpow2.f32 %v1014_v20 }
 0x22d   : > { %5647 = vpow2.f32 %v1189_v21 }
 0x231   : > { %v1010_v24 = vpop.f32.mrb[10].mxu1 }
 0x232   : > { %v1016_v27 = vmul.f32 1.442695, %v1010_v24  ;;  %v4966_v28 = vpop.f32.mrb[11].mxu1 }
 0x234   : > { %5649 = vpow2.f32 %v1016_v27 }
 0x236   : > { %v5646_v29 = vpop.eup %5645 }
 0x237   : > { %v5648_v31 = vpop.eup %5647  ;;  %v1019_v35 = vsel %vm1018_vm3, %v5646_v29, 0.0 }
 0x238   : > { %v1193_v36 = vsel %vm1018_vm3, %v5648_v31, 0.0  ;;  %1020 = vadd.xlane.f32.xlu1 %v1019_v35 }
 0x239   : > { %1194 = vadd.xlane.f32.xlu0 %v1193_v36  ;;  %v1185_v37 = vpop.f32.mrb[12].mxu1 }
 0x23a   : > { %v1191_v38 = vmul.f32 1.442695, %v1185_v37  ;;  %v4980_v39 = vpop.f32.mrb[13].mxu1 }
 0x23c   : > { %5651 = vpow2.f32 %v1191_v38 }
 0x23e   : > { %v5650_v40 = vpop.eup %5649 }
 0x23f   : > { %v1022_v42 = vsel %vm1018_vm3, %v5650_v40, 0.0 }
 0x240   : > { %1023 = vadd.xlane.f32.xlu1 %v1022_v42  ;;  %v2143_v42 = vld [vmem:[%s6901_s8] sm:$0xff] }
 0x246   : > { %v5652_v43 = vpop.eup %5651 }
 0x247   : > { %v1196_v44 = vsel %vm1018_vm3, %v5652_v43, 0.0 }
 0x248   : > { %1197 = vadd.xlane.f32.xlu0 %v1196_v44  ;;  %v2145_v44 = vld [vmem:[%s6901_s8 + $0x10] sm:$0xff] }
 0x2c5   : > { %v1021_v46 = vpop.xlane.xlu1 %1020 }
 0x2c6   : > { %v1195_v45 = vpop.xlane.xlu0 %1194 }
 0x2c7   : > { %5653 = vrcp.f32 %v1195_v45 }
 0x2c8   : > { %5655 = vrcp.f32 %v1021_v46  ;;  %v2146_v46 = vld [vmem:[%s6901_s8 + $0x18] sm:$0xff] }
 0x2cd   : > { %v1024_v53 = vpop.xlane.xlu1 %1023 }
 0x2d1   : > { %v5654_v47 = vpop.eup %5653 }
 0x2d2   : > { %v1200_v49 = vmul.f32 %v5654_v47, %v5648_v31  ;;  %v5656_v52 = vpop.eup %5655  ;;  %v5395_v47 = vpack.c.bf16 %v2146_v46, %v2145_v44  ;;  %v2395_v44 = vld [vmem:[%s6907_s14 + $0x18] sm:$0xff]  ;;  %v2396_v46 = vld [vmem:[%s6907_s14 + $0x20] sm:$0xff] }
 0x2d3   : > { %v1026_v54 = vmul.f32 %v5656_v52, %v5646_v29 }
 0x2d4   : > { %4986 = vmatmul.mubr.msk.f32.vlgmr.msra.gmra.mrb[2].mxu0 %vm1018_vm3, %v1200_v49 }
 0x2d5   : > { %5359 = vmatpush3.bf16.msra.mxu0 %v5358_v0  ;;  %v1198_v51 = vpop.xlane.xlu0 %1197  ;;  %4999 = vmatprep.mubr.msk.f32.mxu0 %vm5869_vm1, %v5870_v17 }
 0x2d6   : > { %5657 = vrcp.f32 %v1198_v51  ;;  %5363 = vmatprep.subr.bf16.mxu0 %v5868_v16 }
 0x2d7   : > { %5659 = vrcp.f32 %v1024_v53 }
 0x2dc   : > { %5000 = vmatmul.mubr.msk.f32.vlgmr.msra.gmra.mrb[2].mxu0 %vm1018_vm3, %v1026_v54  ;;  %v4619_v54 = vld [vmem:[%s6902_s9] ss:$0 sm:$0xff] }
 0x2dd   : > { %5013 = vmatprep.mubr.msk.f32.mxu0 %vm5869_vm1, %v5870_v17 }
 0x2de   : > { %5366 = vmatpush3.bf16.xpose.msk.msra.mxu0 %vm6181_vm2, %v6185_v26 }
 0x2df   : > { %5371 = vmatprep.subr.bf16.mxu0 %v5868_v16 }
 0x2e0   : > { %v5658_v55 = vpop.eup %5657 }
 0x2e1   : > { %v1202_v60 = vmul.f32 %v5658_v55, %v5652_v43  ;;  %v5660_v62 = vpop.eup %5659  ;;  %v2144_v43 = vld [vmem:[%s6901_s8 + $0x8] sm:$0xff] }
 0x2e2   : > { %v1028_v63 = vmul.f32 %v5660_v62, %v5650_v40  ;;  %v5391_v45 = vpack.c.bf16 %v2144_v43, %v2143_v42  ;;  %v2394_v43 = vld [vmem:[%s6907_s14 + $0x10] sm:$0xff] }
 0x2e3   : > { %4993 = vmatmul.mubr.msk.f32.vlgmr.msra.gmra.mrb[14].mxu1 %vm1018_vm3, %v1202_v60 }
 0x2e4   : > { %5362 = vmatpush3.bf16.msra.mxu1 %v5361_v10  ;;  %5006 = vmatprep.mubr.msk.f32.mxu1 %vm5869_vm1, %v5870_v17 }
 0x2e5   : > { %5014 = vmatmul.mubr.msk.f32.vlgmr.msra.gmra.mrb[4].mxu0 %vm653_vm0, %v1507_v61  ;;  %5367 = vmatprep.subr.bf16.mxu1 %v5868_v16 }
 0x2e6   : > { %5373 = vmatpush3.bf16.msra.mxu0 %v5372_v4  ;;  %5027 = vmatprep.mubr.msk.f32.mxu0 %vm5869_vm1, %v5870_v17 }
 0x2e7   : > { %5377 = vmatprep.subr.bf16.mxu0 %v5868_v16 }
 0x2eb   : > { %5007 = vmatmul.mubr.msk.f32.vlgmr.msra.gmra.mrb[14].mxu1 %vm1018_vm3, %v1028_v63 }
 0x2ec   : > { %5020 = vmatprep.mubr.msk.f32.mxu1 %vm5869_vm1, %v5870_v17 }
 0x2ed   : > { %5370 = vmatpush3.bf16.xpose.msk.msra.mxu1 %vm6181_vm2, %v6207_v34 }
 0x2ee   : > { %5374 = vmatprep.subr.bf16.mxu1 %v5868_v16 }
 0x2f4   : > { %5021 = vmatmul.mubr.msk.f32.vlgmr.msra.gmra.mrb[16].mxu1 %vm653_vm0, %v1508_v56 }
 0x2f5   : > { %5376 = vmatpush3.bf16.msra.mxu1 %v5375_v11  ;;  %5034 = vmatprep.mubr.msk.f32.mxu1 %vm5869_vm1, %v5870_v17 }
 0x2f6   : > { %5381 = vmatprep.subr.bf16.mxu1 %v5868_v16 }
 0x3b8   : > { %v1578_v57 = vpop.f32.mrb[4].mxu0 }
 0x3b9   : > { %v1655_v0 = vmul.f32 1.442695, %v1578_v57  ;;  %v5015_v2 = vpop.f32.mrb[5].mxu0 }
 0x3bb   : > { %5661 = vpow2.f32 %v1655_v0 }
 0x3c5   : > { %v5662_v4 = vpop.eup %5661 }
 0x3c6   : > { %v1659_v9 = vsel %vm1018_vm3, %v5662_v4, 0.0 }
 0x3c7   : > { %1660 = vadd.xlane.f32.xlu0 %v1659_v9  ;;  %v1651_v10 = vpop.f32.mrb[16].mxu1 }
 0x3c8   : > { %v1657_v18 = vmul.f32 1.442695, %v1651_v10  ;;  %v5022_v19 = vpop.f32.mrb[17].mxu1 }
 0x3ca   : > { %5663 = vpow2.f32 %v1657_v18 }
 0x3d4   : > { %v5664_v20 = vpop.eup %5663 }
 0x3d5   : > { %v1662_v1 = vsel %vm1018_vm3, %v5664_v20, 0.0 }
 0x3d6   : > { %1663 = vadd.xlane.f32.xlu1 %v1662_v1 }
 0x454   : > { %v1661_v3 = vpop.xlane.xlu0 %1660 }
 0x455   : > { %5665 = vrcp.f32 %v1661_v3 }
 0x45f   : > { %v5666_v11 = vpop.eup %5665 }
 0x460   : > { %v1666_v21 = vmul.f32 %v5666_v11, %v5662_v4  ;;  %v2283_v11 = vld [vmem:[%s6905_s12 + $0x8] sm:$0xff] }
 0x462   : > { %5028 = vmatmul.mubr.msk.f32.vlgmr.msra.gmra.mrb[2].mxu0 %vm1018_vm3, %v1666_v21 }
 0x463   : > { %5380 = vmatpush3.bf16.xpose.msk.msra.mxu0 %vm6181_vm2, %v6185_v26  ;;  %v1664_v22 = vpop.xlane.xlu1 %1663  ;;  %5041 = vmatprep.mubr.msk.f32.mxu0 %vm5869_vm1, %v5870_v17 }
 0x464   : > { %5667 = vrcp.f32 %v1664_v22  ;;  %5385 = vmatprep.subr.bf16.mxu0 %v5868_v16  ;;  %v2284_v22 = vld [vmem:[%s6905_s12 + $0x10] sm:$0xff] }
 0x46a   : > { %5042 = vmatmul.mubr.msk.f32.vlgmr.msra.gmra.mrb[6].mxu0 %vm653_vm0, %v1829_v23  ;;  %v2285_v23 = vld [vmem:[%s6905_s12 + $0x18] sm:$0xff] }
 0x46b   : > { %5387 = vmatpush3.bf16.msra.mxu0 %v5386_v8  ;;  %5055 = vmatprep.mubr.msk.f32.mxu0 %vm5869_vm1, %v5870_v17 }
 0x46c   : > { %5392 = vmatprep.subr.bf16.mxu0 %v5391_v45 }
 0x46e   : > { %v5668_v26 = vpop.eup %5667 }
 0x46f   : > { %v1668_v24 = vmul.f32 %v5668_v26, %v5664_v20  ;;  %v5403_v26 = vpack.c.bf16 %v2285_v23, %v2284_v22 }
 0x471   : > { %5035 = vmatmul.mubr.msk.f32.vlgmr.msra.gmra.mrb[14].mxu1 %vm1018_vm3, %v1668_v24  ;;  %v2392_v24 = vld [vmem:[%s6907_s14] sm:$0xff] }
 0x472   : > { %5384 = vmatpush3.bf16.xpose.msk.msra.mxu1 %vm6181_vm2, %v6207_v34  ;;  %5048 = vmatprep.mubr.msk.f32.mxu1 %vm5869_vm1, %v5870_v17 }
 0x473   : > { %5388 = vmatprep.subr.bf16.mxu1 %v5868_v16 }
 0x479   : > { %5049 = vmatmul.mubr.msk.f32.vlgmr.msra.gmra.mrb[18].mxu1 %vm653_vm0, %v1830_v58  ;;  %v2393_v58 = vld [vmem:[%s6907_s14 + $0x8] sm:$0xff] }
 0x47a   : > { %5390 = vmatpush3.bf16.msra.mxu1 %v5389_v14  ;;  %5062 = vmatprep.mubr.msk.f32.mxu1 %vm5869_vm1, %v5870_v17 }
 0x53d   : > { %v1900_v59 = vpop.f32.mrb[6].mxu0 }
 0x53e   : > { %v1977_v8 = vmul.f32 1.442695, %v1900_v59  ;;  %v5043_v34 = vpop.f32.mrb[7].mxu0  ;;  %v5407_v59 = vpack.c.bf16 %v2393_v58, %v2392_v24 }
 0x540   : > { %5669 = vpow2.f32 %v1977_v8 }
 0x54a   : > { %v5670_v27 = vpop.eup %5669 }
 0x54b   : > { %v1981_v28 = vsel %vm1018_vm3, %v5670_v27, 0.0 }
 0x54c   : > { %1982 = vadd.xlane.f32.xlu0 %v1981_v28  ;;  %v1973_v29 = vpop.f32.mrb[18].mxu1 }
 0x54d   : > { %v1979_v31 = vmul.f32 1.442695, %v1973_v29  ;;  %v5050_v35 = vpop.f32.mrb[19].mxu1 }
 0x54f   : > { %5671 = vpow2.f32 %v1979_v31 }
 0x559   : > { %v5672_v36 = vpop.eup %5671 }
 0x55a   : > { %v1984_v37 = vsel %vm1018_vm3, %v5672_v36, 0.0 }
 0x55b   : > { %1985 = vadd.xlane.f32.xlu1 %v1984_v37 }
 0x5d9   : > { %v1983_v6 = vpop.xlane.xlu0 %1982 }
 0x5da   : > { %5673 = vrcp.f32 %v1983_v6 }
 0x5e4   : > { %v5674_v7 = vpop.eup %5673 }
 0x5e5   : > { %v1988_v14 = vmul.f32 %v5674_v7, %v5670_v27 }
 0x5e7   : > { %5056 = vmatmul.mubr.msk.f32.vlgmr.msra.gmra.mrb[2].mxu0 %vm1018_vm3, %v1988_v14  ;;  %v4623_v14 = vld [vmem:[%s6968_s1] ss:$0 sm:$0xff] }
 0x5e8   : > { %v1986_v38 = vpop.xlane.xlu1 %1985  ;;  %5394 = vmatpush3.bf16.msra.mxu0 %v5391_v45  ;;  %v5411_v45 = vpack.c.bf16 %v2395_v44, %v2394_v43 }
 0x5e9   : > { %5675 = vrcp.f32 %v1986_v38  ;;  %5396 = vmatprep.subr.bf16.mxu0 %v5395_v47 }
 0x5ec   : > { %5398 = vmatpush3.bf16.msra.mxu0 %v5395_v47  ;;  %v2397_v47 = vld [vmem:[%s6907_s14 + $0x28] sm:$0xff] }
 0x5ed   : > { %5408 = vmatprep.subr.bf16.mxu0 %v5407_v59 }
 0x5f3   : > { %v5676_v39 = vpop.eup %5675 }
 0x5f4   : > { %v1990_v40 = vmul.f32 %v5676_v39, %v5672_v36  ;;  %v4622_v36 = vld [vmem:[%s6903_s10] ss:$0 sm:$0xff] }
 0x5f6   : > { %5063 = vmatmul.mubr.msk.f32.vlgmr.msra.gmra.mrb[14].mxu1 %vm1018_vm3, %v1990_v40 }
 0x6ba   : > { %v2064_v49 = vpop.f32.mrb[2].mxu0 }
 0x6bb   : > { %v5057_v51 = vpop.f32.mrb[3].mxu0  ;;  %5073 = vmatprep.mubr.msk.f32.mxu0 %vm653_vm0, %v2064_v49  ;;  %v5415_v49 = vpack.c.bf16 %v2397_v47, %v2396_v46 }
 0x6bc   : > { %v2398_v51 = vld [vmem:[%s6907_s14 + $0x30] sm:$0xff] }
 0x6c9   : > { %v2137_v52 = vpop.f32.mrb[14].mxu1 }
 0x6ca   : > { %v5064_v53 = vpop.f32.mrb[15].mxu1  ;;  %5074 = vmatmul.mubr.msk.f32.vlgmr.msra.gmra.mrb[8].mxu0 %vm653_vm0, %v2137_v52  ;;  %v2399_v52 = vld [vmem:[%s6907_s14 + $0x38] sm:$0xff] }
 0x6cb   : > { %5410 = vmatpush3.bf16.msra.mxu0 %v5407_v59  ;;  %v5419_v53 = vpack.c.bf16 %v2399_v52, %v2398_v51 }
 0x6cc   : > { %5412 = vmatprep.subr.bf16.mxu0 %v5411_v45 }
 0x6cf   : > { %5414 = vmatpush3.bf16.msra.mxu0 %v5411_v45 }
 0x6d0   : > { %5416 = vmatprep.subr.bf16.mxu0 %v5415_v49 }
 0x6d3   : > { %5418 = vmatpush3.bf16.msra.mxu0 %v5415_v49 }
 0x6d4   : > { %5420 = vmatprep.subr.bf16.mxu0 %v5419_v53 }
 0x6d7   : > { %5422 = vmatpush3.bf16.msra.mxu0 %v5419_v53 }
 0x79d   : > { %v5075_v55 = vpop.f32.mrb[8].mxu0 }
 0x79e   : > { %v2232_v60 = vadd.f32 %v5075_v55, %v4619_v54  ;;  %v2226_v61 = vpop.f32.mrb[9].mxu0  ;;  %v2401_v55 = vld [vmem:[%s6907_s14 + $0x48] sm:$0xff] }
 0x79f   : > { %v2227_v62 = vadd.f32 %v4619_v54, %v2226_v61  ;;  %v2400_v54 = vld [vmem:[%s6907_s14 + $0x40] sm:$0xff]  ;;  %v2402_v61 = vld [vmem:[%s6907_s14 + $0x50] sm:$0xff] }
 0x7a0   : > { %v2236_v63 = vadd.f32 %v2232_v60, %v6216_v41  ;;  %v5423_v60 = vpack.c.bf16 %v2401_v55, %v2400_v54 }
 0x7a1   : > { %v2235_v56 = vadd.f32 %v2227_v62, %v6187_v30  ;;  %v2282_v30 = vld [vmem:[%s6905_s12] sm:$0xff]  ;;  %v2403_v62 = vld [vmem:[%s6907_s14 + $0x58] sm:$0xff] }
 0x7a2   : > { %v2242_v57 = vsel %vm653_vm0, %v2236_v63, 0.0  ;;  %v5399_v21 = vpack.c.bf16 %v2283_v11, %v2282_v30  ;;  %5424 = vmatprep.subr.bf16.mxu0 %v5423_v60 }
 0x7a3   : > { %2243 = vadd.xlane.f32.xlu1 %v2242_v57  ;;  %v2239_v0 = vsel %vm653_vm0, %v2235_v56, 0.0  ;;  %v2405_v57 = vld [vmem:[%s6907_s14 + $0x68] sm:$0xff]  ;;  %5426 = vmatpush3.bf16.msra.mxu0 %v5423_v60 }
 0x7a4   : > { %2240 = vadd.xlane.f32.xlu0 %v2239_v0  ;;  %5400 = vmatprep.subr.bf16.mxu1 %v5399_v21 }
 0x7a5   : > { %5402 = vmatpush3.bf16.msra.mxu1 %v5399_v21 }
 0x7a6   : > { %5404 = vmatprep.subr.bf16.mxu1 %v5403_v26 }
 0x7a9   : > { %5406 = vmatpush3.bf16.msra.mxu1 %v5403_v26 }
 0x830   : > { %v2244_v2 = vpop.xlane.xlu1 %2243 }
 0x831   : > { %v2247_v4 = vmul.f32 0.03125, %v2244_v2  ;;  %v2241_v9 = vpop.xlane.xlu0 %2240  ;;  %v2406_v2 = vld [vmem:[%s6907_s14 + $0x70] sm:$0xff] }
 0x832   : > { %v2246_v10 = vmul.f32 0.03125, %v2241_v9 }
 0x833   : > { %v2249_v18 = vsub.f32 %v2236_v63, %v2247_v4  ;;  %v5427_v63 = vpack.c.bf16 %v2403_v62, %v2402_v61  ;;  %v2407_v4 = vld [vmem:[%s6907_s14 + $0x78] sm:$0xff] }
 0x834   : > { %v2248_v19 = vsub.f32 %v2235_v56, %v2246_v10  ;;  %v2404_v56 = vld [vmem:[%s6907_s14 + $0x60] sm:$0xff]  ;;  %v5435_v9 = vpack.c.bf16 %v2407_v4, %v2406_v2  ;;  %v4642_v2 = vld [vmem:[%s6899_s6 + $0x30] sm:$0xff]  ;;  %v4643_v4 = vld [vmem:[%s6899_s6 + $0x38] sm:$0xff] }
 0x835   : > { %v2251_v20 = vmul.f32 %v2249_v18, %v2249_v18  ;;  %5428 = vmatprep.subr.bf16.mxu0 %v5427_v63  ;;  %v5431_v0 = vpack.c.bf16 %v2405_v57, %v2404_v56  ;;  %v4624_v10 = vld [vmem:[%s6969_s21] ss:$0 sm:$0xff]  ;;  %v4641_v57 = vld [vmem:[%s6899_s6 + $0x28] sm:$0xff] }
 0x836   : > { %v2250_v1 = vmul.f32 %v2248_v19, %v2248_v19  ;;  %5430 = vmatpush3.bf16.msra.mxu0 %v5427_v63 }
 0x837   : > { %v2255_v3 = vsel %vm653_vm0, %v2251_v20, 0.0  ;;  %5432 = vmatprep.subr.bf16.mxu0 %v5431_v0 }
 0x838   : > { %2256 = vadd.xlane.f32.xlu1 %v2255_v3  ;;  %v2252_v41 = vsel %vm653_vm0, %v2250_v1, 0.0 }
 0x839   : > { %2253 = vadd.xlane.f32.xlu0 %v2252_v41 }
 0x83a   : > { %5434 = vmatpush3.bf16.msra.mxu0 %v5431_v0 }
 0x83b   : > { %5436 = vmatprep.subr.bf16.mxu0 %v5435_v9 }
 0x83e   : > { %5438 = vmatpush3.bf16.msra.mxu0 %v5435_v9  ;;  %v5451_v9 = vpack.c.bf16 %v4643_v4, %v4642_v2 }
 0x83f   : > { %5463 = vmatprep.subr.bf16.mxu0 %v5868_v16 }
 0x8c5   : > { %v2257_v8 = vpop.xlane.xlu1 %2256 }
 0x8c6   : > { %v2259_v34 = vmul.f32 0.03125, %v2257_v8  ;;  %v2254_v27 = vpop.xlane.xlu0 %2253 }
 0x8c7   : > { %v2258_v28 = vmul.f32 0.03125, %v2254_v27 }
 0x8c8   : > { %v2261_v29 = vadd.f32 1e-05, %v2259_v34 }
 0x8c9   : > { %v2260_v31 = vadd.f32 1e-05, %v2258_v28 }
 0x8ca   : > { %5677 = vrsqrt.f32 %v2261_v29 }
 0x8cb   : > { %5679 = vrsqrt.f32 %v2260_v31 }
 0x8d4   : > { %v5678_v35 = vpop.eup %5677 }
 0x8d5   : > { %v5680_v37 = vpop.eup %5679  ;;  %v2265_v6 = vmul.f32 %v5678_v35, %v2249_v18 }
 0x8d6   : > { %v2264_v7 = vmul.f32 %v5680_v37, %v2248_v19  ;;  %v4631_v37 = vld [vmem:[%s6897_s4 + $0x28] sm:$0xff] }
 0x8d7   : > { %v2273_v38 = vmul.f32 %v4622_v36, %v2265_v6  ;;  %v4632_v6 = vld [vmem:[%s6897_s4 + $0x30] sm:$0xff] }
 0x8d8   : > { %v2272_v39 = vmul.f32 %v4622_v36, %v2264_v7  ;;  %v4630_v36 = vld [vmem:[%s6897_s4 + $0x20] sm:$0xff] }
 0x8d9   : > { %v6436_v42 = vadd.f32 %v4623_v14, %v2273_v38  ;;  %v5439_v7 = vpack.c.bf16 %v4631_v37, %v4630_v36 }
 0x8da   : > { %v6434_v40 = vadd.f32 %v4623_v14, %v2272_v39  ;;  %v4633_v14 = vld [vmem:[%s6897_s4 + $0x38] sm:$0xff]  ;;  %v4627_v39 = vld [vmem:[%s6970_s11] ss:$0 sm:$0xff] }
 0x8db   : > { %v5443_v38 = vpack.c.bf16 %v4633_v14, %v4632_v6  ;;  %5440 = vmatprep.subr.bf16.mxu1 %v5439_v7 }
 0x8dc   : > { %5084 = vmatprep.mubr.msk.f32.mxu1 %vm653_vm0, %v6434_v40 }
 0x8dd   : > { %5085 = vmatmul.mubr.msk.f32.vlgmr.msra.gmra.mrb[20].mxu1 %vm653_vm0, %v6436_v42 }
 0x8de   : > { %5130 = vmatprep.mubr.msk.f32.mxu1 %vm653_vm0, %v6133_v5  ;;  %5442 = vmatpush3.bf16.msra.mxu1 %v5439_v7 }
 0x8df   : > { %5444 = vmatprep.subr.bf16.mxu1 %v5443_v38 }
 0x8e2   : > { %5446 = vmatpush3.bf16.msra.mxu1 %v5443_v38  ;;  %v4645_v38 = vld [vmem:[%s6900_s7 + $0x1] ss:$0 sm:$0xff] }
 0x8e5   : > { %5131 = vmatmul.mubr.msk.f32.vlgmr.msra.gmra.mrb[22].mxu1 %vm653_vm0, %v6149_v12 }
 0x8e6   : > { %5133 = vmatprep.mubr.msk.f32.mxu1 %vm653_vm0, %v6151_v13 }
 0x8e9   : > { %5134 = vmatmul.mubr.msk.f32.gmra.mrb[24].mxu1 %vm653_vm0, %v6157_v15 }
 0x8ea   : > { %5144 = vmatprep.mubr.msk.f32.mxu1 %vm653_vm0, %v6133_v5 }
 0x9b0   : > { %v5086_v18 = vpop.f32.mrb[20].mxu1 }
 0x9b1   : > { %v2371_v19 = vadd.f32 %v5086_v18, %v4624_v10  ;;  %v2365_v20 = vpop.f32.mrb[21].mxu1  ;;  %v4635_v18 = vld [vmem:[%s6898_s5 + $0x1] ss:$0 sm:$0xff] }
 0x9b2   : > { %v2366_v1 = vadd.f32 %v4624_v10, %v2365_v20 }
 0x9b3   : > { %v2377_v3 = vmul.f32 0.044715, %v2371_v19  ;;  %v2375_v29 = vmul.f32 0.5, %v2371_v19 }
 0x9b4   : > { %v2376_v41 = vmul.f32 0.044715, %v2366_v1  ;;  %v2374_v27 = vmul.f32 0.5, %v2366_v1 }
 0x9b5   : > { %v2379_v30 = vmul.f32 %v2377_v3, %v2371_v19 }
 0x9b6   : > { %v2378_v11 = vmul.f32 %v2376_v41, %v2366_v1 }
 0x9b7   : > { %v2381_v21 = vmul.f32 %v2379_v30, %v2371_v19 }
 0x9b8   : > { %v2380_v22 = vmul.f32 %v2378_v11, %v2366_v1  ;;  %v5132_v10 = vpop.f32.mrb[22].mxu1 }
 0x9b9   : > { %v2383_v23 = vadd.f32 %v2381_v21, %v2371_v19  ;;  %v2615_v19 = vpop.f32.mrb[23].mxu1  ;;  %v2621_v20 = vadd.f32 %v5132_v10, %v4635_v18 }
 0x9ba   : > { %v2382_v26 = vadd.f32 %v2380_v22, %v2366_v1  ;;  %v2616_v1 = vadd.f32 %v4635_v18, %v2615_v19 }
 0x9bb   : > { %v2385_v24 = vmul.f32 0.7978846, %v2383_v23 }
 0x9bc   : > { %v2384_v58 = vmul.f32 0.7978846, %v2382_v26  ;;  %v6541_v3 = vpack.c.bf16 %v2621_v20, %v2616_v1 }
 0x9bd   : > { %5681 = vtanh.f32 %v2385_v24 }
 0x9be   : > { %5683 = vtanh.f32 %v2384_v58 }
 0x9c7   : > { %v5682_v59 = vpop.eup %5681 }
 0x9c8   : > { %v5684_v8 = vpop.eup %5683  ;;  %v2389_v34 = vadd.f32 1.0, %v5682_v59 }
 0x9c9   : > { %v2388_v28 = vadd.f32 1.0, %v5684_v8  ;;  %v4628_v8 = vld [vmem:[%s6971_s26] ss:$0 sm:$0xff] }
 0x9ca   : > { %v2391_v35 = vmul.f32 %v2389_v34, %v2375_v29 }
 0x9cb   : > { %v2390_v31 = vmul.f32 %v2388_v28, %v2374_v27  ;;  %v4629_v27 = vld [vmem:[%s6972_s29] ss:$0 sm:$0xff]  ;;  %s624_s29 = scalar_lea.vmem [#allocation7], %s4566_s15  ;;  %s5871_s15 = smov [#allocation7]  }
 0x9cc   : > { %s4464_s22 = sshll.u32 %s624_s29, 4  ;;  %s6851_s22 = int_to_ptr.vmem [resolvable:$true] %s4464_s22 }
 0x9cd   : > { %5119 = vmatprep.mubr.f32.mxu0 %v2390_v31  ;;  %s5792_s0 = scalar_lea.vmem %s6851_s22, 32 }
 0x9ce   : > { %5120 = vmatmul.mubr.f32.vlgmr.msra.gmra.mrb[10].mxu0 %v2391_v35  ;;  %p5793_p10 = scmp.ne.s32.totalorder %s6851_s22, %s5792_s0 }
 0x9cf   : > { %5168 = vmatprep.mubr.msk.f32.mxu0 %vm5869_vm1, %v5870_v17  ;;  %5466 = vmatpush3.bf16.xpose.msk.msra.mxu0 %vm6181_vm2, %v6541_v3 }
 0x9d0   : > { %5471 = vmatprep.subr.bf16.mxu0 %v5868_v16  ;;  %p5794_p4 = pnand %p5793_p10, %p6976_p2 }
 0x9d2   : > { %p5795_p5 = pneg %p5794_p4 }
 0xaa1   : > { %v5121_v43 = vpop.f32.mrb[10].mxu0 }
 0xaa2   : > { %v2487_v44 = vadd.f32 %v5121_v43, %v4627_v39  ;;  %v2481_v45 = vpop.f32.mrb[11].mxu0 }
 0xaa3   : > { %v2482_v46 = vadd.f32 %v4627_v39, %v2481_v45 }
 0xaa4   : > { %v2491_v47 = vadd.f32 %v2487_v44, %v6436_v42 }
 0xaa5   : > { %v2490_v49 = vadd.f32 %v2482_v46, %v6434_v40  ;;  %v4640_v40 = vld [vmem:[%s6899_s6 + $0x20] sm:$0xff] }
 0xaa6   : > { %v2497_v51 = vsel %vm653_vm0, %v2491_v47, 0.0  ;;  %v5447_v0 = vpack.c.bf16 %v4641_v57, %v4640_v40 }
 0xaa7   : > { %2498 = vadd.xlane.f32.xlu1 %v2497_v51  ;;  %v2494_v52 = vsel %vm653_vm0, %v2490_v49, 0.0 }
 0xaa8   : > { %2495 = vadd.xlane.f32.xlu0 %v2494_v52  ;;  %5448 = vmatprep.subr.bf16.mxu1 %v5447_v0 }
 0xaa9   : > { %5450 = vmatpush3.bf16.msra.mxu1 %v5447_v0 }
 0xaaa   : > { %5452 = vmatprep.subr.bf16.mxu1 %v5451_v9 }
 0xaad   : > { %5454 = vmatpush3.bf16.msra.mxu1 %v5451_v9 }
 0xaae   : > { %5455 = vmatprep.subr.bf16.mxu1 %v5868_v16 }
 0xab0   : > { %5145 = vmatmul.mubr.msk.f32.vlgmr.msra.gmra.mrb[26].mxu1 %vm653_vm0, %v6149_v12  ;;  %v5135_v12 = vpop.f32.mrb[24].mxu1 }
 0xab1   : > { %5147 = vmatprep.mubr.msk.f32.mxu1 %vm653_vm0, %v6151_v13  ;;  %v2625_v13 = vpop.f32.mrb[25].mxu1  ;;  %v2631_v41 = vadd.f32 %v5135_v12, %v4635_v18 }
 0xab2   : > { %v2626_v30 = vadd.f32 %v4635_v18, %v2625_v13 }
 0xab4   : > { %5148 = vmatmul.mubr.msk.f32.gmra.mrb[28].mxu1 %vm653_vm0, %v6157_v15  ;;  %v6555_v15 = vpack.c.bf16 %v2631_v41, %v2626_v30 }
 0xab5   : > { %5154 = vmatprep.mubr.msk.f32.mxu1 %vm5869_vm1, %v5870_v17 }
 0xab6   : > { %5458 = vmatpush3.bf16.xpose.msk.msra.mxu1 %vm6181_vm2, %v6541_v3 }
 0xab7   : > { %5459 = vmatprep.subr.bf16.mxu1 %v5868_v16 }
 0xb34   : > { %v2499_v53 = vpop.xlane.xlu1 %2498 }
 0xb35   : > { %v2501_v5 = vmul.f32 0.03125, %v2499_v53  ;;  %v2496_v54 = vpop.xlane.xlu0 %2495 }
 0xb36   : > { %v2500_v55 = vmul.f32 0.03125, %v2496_v54 }
 0xb37   : > { %v2503_v60 = vsub.f32 %v2491_v47, %v2501_v5 }
 0xb38   : > { %v2502_v61 = vsub.f32 %v2490_v49, %v2500_v55 }
 0xb39   : > { %v2505_v62 = vmul.f32 %v2503_v60, %v2503_v60 }
 0xb3a   : > { %v2504_v63 = vmul.f32 %v2502_v61, %v2502_v61 }
 0xb3b   : > { %v2509_v56 = vsel %vm653_vm0, %v2505_v62, 0.0 }
 0xb3c   : > { %2510 = vadd.xlane.f32.xlu1 %v2509_v56  ;;  %v2506_v42 = vsel %vm653_vm0, %v2504_v63, 0.0 }
 0xb3d   : > { %2507 = vadd.xlane.f32.xlu0 %v2506_v42 }
 0xb83   : > { %v5146_v39 = vpop.f32.mrb[26].mxu1 }
 0xb84   : > { %v2719_v43 = vadd.f32 %v5146_v39, %v4645_v38  ;;  %v2713_v44 = vpop.f32.mrb[27].mxu1 }
 0xb85   : > { %v2714_v45 = vadd.f32 %v4645_v38, %v2713_v44 }
 0xb86   : > { %v3087_v46 = vmul.f32 %v6203_v33, %v2719_v43  ;;  %v2914_v53 = vmul.f32 %v6198_v32, %v2719_v43  ;;  %v6610_v62 = vmul.f32 %v6254_v50, %v2719_v43 }
 0xb87   : > { %v3086_v47 = vmul.f32 %v6203_v33, %v2714_v45  ;;  %v5149_v49 = vpop.f32.mrb[28].mxu1  ;;  %v2913_v5 = vmul.f32 %v6198_v32, %v2714_v45  ;;  %v6613_v63 = vmul.f32 %v6254_v50, %v2714_v45 }
 0xb88   : > { %v2723_v51 = vpop.f32.mrb[29].mxu1  ;;  %v2729_v54 = vadd.f32 %v5149_v49, %v4645_v38 }
 0xb89   : > { %v5472_v52 = vpack.c.bf16 %v3087_v46, %v3086_v47  ;;  %v2724_v55 = vadd.f32 %v4645_v38, %v2723_v51  ;;  %v5478_v57 = vpack.c.bf16 %v2914_v53, %v2913_v5 }
 0xb8a   : > { %v6616_v56 = vmul.f32 %v6198_v32, %v2729_v54  ;;  %v3089_v42 = vmul.f32 %v6203_v33, %v2729_v54  ;;  %v6621_v0 = vmul.f32 %v6246_v48, %v2729_v54  ;;  %v6632_v10 = vmul.f32 %v6254_v50, %v2729_v54 }
 0xb8b   : > { %v3088_v40 = vmul.f32 %v6203_v33, %v2724_v55  ;;  %v6624_v2 = vmul.f32 %v6198_v32, %v2724_v55  ;;  %v6627_v4 = vmul.f32 %v6246_v48, %v2724_v55  ;;  %v6635_v18 = vmul.f32 %v6254_v50, %v2724_v55 }
 0xb8d   : > { %v5475_v19 = vpack.c.bf16 %v3089_v42, %v3088_v40  ;;  %v5495_v20 = vpack.c.bf16 %v6621_v0, %v6627_v4  ;;  %v5509_v1 = vpack.c.bf16 %v6632_v10, %v6635_v18 }
 0xbc9   : > { %v2511_v11 = vpop.xlane.xlu1 %2510 }
 0xbca   : > { %v2513_v21 = vmul.f32 0.03125, %v2511_v11  ;;  %v2508_v22 = vpop.xlane.xlu0 %2507 }
 0xbcb   : > { %v2512_v23 = vmul.f32 0.03125, %v2508_v22 }
 0xbcc   : > { %v2515_v26 = vadd.f32 1e-05, %v2513_v21 }
 0xbcd   : > { %v2514_v24 = vadd.f32 1e-05, %v2512_v23 }
 0xbce   : > { %5685 = vrsqrt.f32 %v2515_v26 }
 0xbcf   : > { %5687 = vrsqrt.f32 %v2514_v24 }
 0xbd8   : > { %v5686_v58 = vpop.eup %5685 }
 0xbd9   : > { %v5688_v59 = vpop.eup %5687  ;;  %v2519_v28 = vmul.f32 %v5686_v58, %v2503_v60  ;;  %v6603_v60 = vmul.f32 %v6246_v48, %v2719_v43 }
 0xbda   : > { %v2518_v34 = vmul.f32 %v5688_v59, %v2502_v61  ;;  %v6606_v61 = vmul.f32 %v6246_v48, %v2714_v45 }
 0xbdb   : > { %v2527_v35 = vmul.f32 %v4628_v8, %v2519_v28 }
 0xbdc   : > { %v2526_v29 = vmul.f32 %v4628_v8, %v2518_v34  ;;  %v5492_v9 = vpack.c.bf16 %v6603_v60, %v6606_v61 }
 0xbdd   : > { %v6576_v6 = vadd.f32 %v4629_v27, %v2527_v35 }
 0xbde   : > { %v6563_v31 = vadd.f32 %v4629_v27, %v2526_v29 }
 0xbdf   : > { %v2740_v7 = vmul.f32 %v6198_v32, %v6576_v6  ;;  %v2925_v14 = vmul.f32 %v6203_v33, %v6576_v6  ;;  %v3390_v53 = vmul.f32 %v6246_v48, %v6576_v6 }
 0xbe0   : > { %v2739_v36 = vmul.f32 %v6198_v32, %v6563_v31  ;;  %v2924_v37 = vmul.f32 %v6203_v33, %v6563_v31  ;;  %v5506_v33 = vpack.c.bf16 %v6610_v62, %v6613_v63  ;;  %v5481_v32 = vpack.c.bf16 %v6616_v56, %v6624_v2 }
 0xbe1   : > { %v3389_v49 = vmul.f32 %v6246_v48, %v6563_v31 }
 0xbe2   : > { %5155 = vmatmul.mubr.msk.f32.vlgmr.msra.gmra.mrb[30].mxu1 %vm653_vm0, %v2739_v36  ;;  %5169 = vmatmul.mubr.msk.f32.vlgmr.msra.gmra.mrb[12].mxu0 %vm653_vm0, %v2924_v37 }
 0xbe3   : > { %5462 = vmatpush3.bf16.xpose.msk.msra.mxu1 %vm6181_vm2, %v6555_v15  ;;  %5161 = vmatprep.mubr.msk.f32.mxu1 %vm5869_vm1, %v5870_v17 }
 0xbe4   : > { %5467 = vmatprep.subr.bf16.mxu1 %v5868_v16  ;;  %5182 = vmatprep.mubr.msk.f32.mxu0 %vm5869_vm1, %v5870_v17 }
 0xbe5   : > { %5473 = vmatpush3.bf16.msra.mxu0 %v5472_v52 }
 0xbe6   : > { %5477 = vmatprep.subr.bf16.mxu0 %v5868_v16 }
 0xbea   : > { %5162 = vmatmul.mubr.msk.f32.vlgmr.msra.gmra.mrb[32].mxu1 %vm653_vm0, %v2740_v7 }
 0xbeb   : > { %5470 = vmatpush3.bf16.xpose.msk.msra.mxu1 %vm6181_vm2, %v6555_v15  ;;  %5175 = vmatprep.mubr.msk.f32.mxu1 %vm5869_vm1, %v5870_v17 }
 0xbec   : > { %5474 = vmatprep.subr.bf16.mxu1 %v5868_v16 }
 0xbf2   : > { %5176 = vmatmul.mubr.msk.f32.vlgmr.msra.gmra.mrb[34].mxu1 %vm653_vm0, %v2925_v14 }
 0xbf3   : > { %5189 = vmatprep.mubr.msk.f32.mxu1 %vm5869_vm1, %v5870_v17  ;;  %5476 = vmatpush3.bf16.msra.mxu1 %v5475_v19  ;;  %v5733_v19 = vld [vmem:[%s6967_s3 + $0x3] ss:$0 sm:$0xff] }
 0xbf4   : > { %5480 = vmatprep.subr.bf16.mxu1 %v5868_v16 }
 0xcb5   : > { %v2816_v12 = vpop.f32.mrb[30].mxu1  ;;  %v2995_v13 = vpop.f32.mrb[12].mxu0 }
 0xcb6   : > { %v3072_v50 = vmul.f32 1.442695, %v2995_v13  ;;  %v5156_v41 = vpop.f32.mrb[31].mxu1  ;;  %v5170_v30 = vpop.f32.mrb[13].mxu0  ;;  %v2899_v11 = vmul.f32 1.442695, %v2816_v12  ;;  %v3711_v12 = vmul.f32 %v5733_v19, %v6576_v6 }
 0xcb8   : > { %5689 = vpow2.f32 %v3072_v50 }
 0xcb9   : > { %5691 = vpow2.f32 %v2899_v11 }
 0xcbd   : > { %v2895_v21 = vpop.f32.mrb[32].mxu1 }
 0xcbe   : > { %v5163_v22 = vpop.f32.mrb[33].mxu1  ;;  %v2901_v59 = vmul.f32 1.442695, %v2895_v21 }
 0xcbf   : > { %v4689_v22 = vld [vmem:[%s6901_s8 + $0x20] sm:$0xff] }
 0xcc2   : > { %v5690_v23 = vpop.eup %5689 }
 0xcc3   : > { %v3076_v26 = vsel %vm1018_vm3, %v5690_v23, 0.0  ;;  %v5692_v24 = vpop.eup %5691 }
 0xcc4   : > { %3077 = vadd.xlane.f32.xlu0 %v3076_v26  ;;  %v2903_v27 = vsel %vm1018_vm3, %v5692_v24, 0.0  ;;  %v4691_v26 = vld [vmem:[%s6901_s8 + $0x30] sm:$0xff] }
 0xcc5   : > { %v3068_v58 = vpop.f32.mrb[34].mxu1 }
 0xcc6   : > { %v3074_v8 = vmul.f32 1.442695, %v3068_v58  ;;  %v5177_v34 = vpop.f32.mrb[35].mxu1  ;;  %v4692_v58 = vld [vmem:[%s6901_s8 + $0x38] sm:$0xff] }
 0xcc8   : > { %5693 = vpow2.f32 %v3074_v8  ;;  %2904 = vadd.xlane.f32.xlu0 %v2903_v27 }
 0xcc9   : > { %5695 = vpow2.f32 %v2901_v59  ;;  %v5515_v59 = vpack.c.bf16 %v4692_v58, %v4691_v26 }
 0xcd2   : > { %v5694_v28 = vpop.eup %5693 }
 0xcd3   : > { %v3079_v29 = vsel %vm1018_vm3, %v5694_v28, 0.0  ;;  %v5696_v35 = vpop.eup %5695 }
 0xcd4   : > { %3080 = vadd.xlane.f32.xlu1 %v3079_v29  ;;  %v2906_v36 = vsel %vm1018_vm3, %v5696_v35, 0.0  ;;  %v4694_v29 = vld [vmem:[%s6902_s9 + $0x1] ss:$0 sm:$0xff] }
 0xcd8   : > { %2907 = vadd.xlane.f32.xlu1 %v2906_v36 }
 0xd51   : > { %v3078_v37 = vpop.xlane.xlu0 %3077 }
 0xd52   : > { %5697 = vrcp.f32 %v3078_v37 }
 0xd55   : > { %v2905_v7 = vpop.xlane.xlu0 %2904 }
 0xd56   : > { %5699 = vrcp.f32 %v2905_v7 }
 0xd5c   : > { %v5698_v14 = vpop.eup %5697 }
 0xd5d   : > { %v3083_v38 = vmul.f32 %v5698_v14, %v5690_v23  ;;  %v4690_v23 = vld [vmem:[%s6901_s8 + $0x28] sm:$0xff] }
 0xd5f   : > { %5183 = vmatmul.mubr.msk.f32.vlgmr.msra.gmra.mrb[14].mxu0 %vm1018_vm3, %v3083_v38 }
 0xd60   : > { %5479 = vmatpush3.bf16.msra.mxu0 %v5478_v57  ;;  %5196 = vmatprep.mubr.msk.f32.mxu0 %vm5869_vm1, %v5870_v17  ;;  %v5700_v43 = vpop.eup %5699 }
 0xd61   : > { %v3081_v39 = vpop.xlane.xlu1 %3080  ;;  %5483 = vmatprep.subr.bf16.mxu0 %v5868_v16  ;;  %v2910_v45 = vmul.f32 %v5700_v43, %v5692_v24  ;;  %v5511_v24 = vpack.c.bf16 %v4690_v23, %v4689_v22  ;;  %v4718_v22 = vld [vmem:[%s6907_s14 + $0xc8] sm:$0xff]  ;;  %v4719_v23 = vld [vmem:[%s6907_s14 + $0xd0] sm:$0xff] }
 0xd62   : > { %5701 = vrcp.f32 %v3081_v39 }
 0xd65   : > { %v2908_v44 = vpop.xlane.xlu1 %2907 }
 0xd66   : > { %5703 = vrcp.f32 %v2908_v44 }
 0xd67   : > { %5197 = vmatmul.mubr.msk.f32.vlgmr.msra.gmra.mrb[14].mxu0 %vm1018_vm3, %v2910_v45 }
 0xd68   : > { %5210 = vmatprep.mubr.msk.f32.mxu0 %vm5869_vm1, %v5870_v17 }
 0xd69   : > { %5486 = vmatpush3.bf16.xpose.msk.msra.mxu0 %vm6181_vm2, %v6541_v3 }
 0xd6a   : > { %5491 = vmatprep.subr.bf16.mxu0 %v5868_v16 }
 0xd6c   : > { %v5702_v46 = vpop.eup %5701 }
 0xd6d   : > { %v3085_v47 = vmul.f32 %v5702_v46, %v5694_v28 }
 0xd6f   : > { %5190 = vmatmul.mubr.msk.f32.vlgmr.msra.gmra.mrb[36].mxu1 %vm1018_vm3, %v3085_v47 }
 0xd70   : > { %5482 = vmatpush3.bf16.msra.mxu1 %v5481_v32  ;;  %5203 = vmatprep.mubr.msk.f32.mxu1 %vm5869_vm1, %v5870_v17  ;;  %v5704_v51 = vpop.eup %5703  ;;  %v3710_v32 = vmul.f32 %v5733_v19, %v6563_v31 }
 0xd71   : > { %5211 = vmatmul.mubr.msk.f32.vlgmr.msra.gmra.mrb[16].mxu0 %vm653_vm0, %v3389_v49  ;;  %5487 = vmatprep.subr.bf16.mxu1 %v5868_v16  ;;  %v2912_v52 = vmul.f32 %v5704_v51, %v5696_v35 }
 0xd72   : > { %5493 = vmatpush3.bf16.msra.mxu0 %v5492_v9  ;;  %5224 = vmatprep.mubr.msk.f32.mxu0 %vm5869_vm1, %v5870_v17 }
 0xd73   : > { %5497 = vmatprep.subr.bf16.mxu0 %v5868_v16 }
 0xd77   : > { %5204 = vmatmul.mubr.msk.f32.vlgmr.msra.gmra.mrb[36].mxu1 %vm1018_vm3, %v2912_v52 }
 0xd78   : > { %5217 = vmatprep.mubr.msk.f32.mxu1 %vm5869_vm1, %v5870_v17 }
 0xd79   : > { %5490 = vmatpush3.bf16.xpose.msk.msra.mxu1 %vm6181_vm2, %v6555_v15 }
 0xd7a   : > { %5494 = vmatprep.subr.bf16.mxu1 %v5868_v16 }
 0xd80   : > { %5218 = vmatmul.mubr.msk.f32.vlgmr.msra.gmra.mrb[38].mxu1 %vm653_vm0, %v3390_v53 }
 0xd81   : > { %5496 = vmatpush3.bf16.msra.mxu1 %v5495_v20  ;;  %5231 = vmatprep.mubr.msk.f32.mxu1 %vm5869_vm1, %v5870_v17 }
 0xd82   : > { %5501 = vmatprep.subr.bf16.mxu1 %v5868_v16 }
 0xe44   : > { %v3460_v5 = vpop.f32.mrb[16].mxu0 }
 0xe45   : > { %v3537_v54 = vmul.f32 1.442695, %v3460_v5  ;;  %v5212_v55 = vpop.f32.mrb[17].mxu0 }
 0xe47   : > { %5705 = vpow2.f32 %v3537_v54  ;;  %v4702_v54 = vld [vmem:[%s6905_s12 + $0x28] sm:$0xff] }
 0xe51   : > { %v5706_v60 = vpop.eup %5705 }
 0xe52   : > { %v3541_v61 = vsel %vm1018_vm3, %v5706_v60, 0.0 }
 0xe53   : > { %3542 = vadd.xlane.f32.xlu0 %v3541_v61  ;;  %v3533_v48 = vpop.f32.mrb[38].mxu1  ;;  %v4704_v61 = vld [vmem:[%s6905_s12 + $0x38] sm:$0xff] }
 0xe54   : > { %v3539_v56 = vmul.f32 1.442695, %v3533_v48  ;;  %v5219_v42 = vpop.f32.mrb[39].mxu1 }
 0xe55   : > { %v4710_v42 = vld [vmem:[%s6907_s14 + $0x88] sm:$0xff] }
 0xe56   : > { %5707 = vpow2.f32 %v3539_v56  ;;  %v4709_v56 = vld [vmem:[%s6907_s14 + $0x80] sm:$0xff] }
 0xe60   : > { %v5708_v40 = vpop.eup %5707 }
 0xe61   : > { %v3544_v57 = vsel %vm1018_vm3, %v5708_v40, 0.0 }
 0xe62   : > { %3545 = vadd.xlane.f32.xlu1 %v3544_v57 }
 0xee0   : > { %v3543_v0 = vpop.xlane.xlu0 %3542 }
 0xee1   : > { %5709 = vrcp.f32 %v3543_v0 }
 0xeeb   : > { %v5710_v2 = vpop.eup %5709 }
 0xeec   : > { %v3548_v4 = vmul.f32 %v5710_v2, %v5706_v60  ;;  %v4703_v60 = vld [vmem:[%s6905_s12 + $0x30] sm:$0xff] }
 0xeed   : > { %v5523_v48 = vpack.c.bf16 %v4704_v61, %v4703_v60 }
 0xeee   : > { %5225 = vmatmul.mubr.msk.f32.vlgmr.msra.gmra.mrb[14].mxu0 %vm1018_vm3, %v3548_v4 }
 0xeef   : > { %5500 = vmatpush3.bf16.xpose.msk.msra.mxu0 %vm6181_vm2, %v6541_v3  ;;  %v3546_v9 = vpop.xlane.xlu1 %3545  ;;  %5238 = vmatprep.mubr.msk.f32.mxu0 %vm5869_vm1, %v5870_v17 }
 0xef0   : > { %5711 = vrcp.f32 %v3546_v9  ;;  %5505 = vmatprep.subr.bf16.mxu0 %v5868_v16 }
 0xef6   : > { %5239 = vmatmul.mubr.msk.f32.vlgmr.msra.gmra.mrb[18].mxu0 %vm653_vm0, %v3710_v32 }
 0xef7   : > { %5507 = vmatpush3.bf16.msra.mxu0 %v5506_v33  ;;  %5252 = vmatprep.mubr.msk.f32.mxu0 %vm5869_vm1, %v5870_v17 }
 0xef8   : > { %5512 = vmatprep.subr.bf16.mxu0 %v5511_v24 }
 0xefa   : > { %v5712_v3 = vpop.eup %5711 }
 0xefb   : > { %v3550_v20 = vmul.f32 %v5712_v3, %v5708_v40  ;;  %v5527_v40 = vpack.c.bf16 %v4710_v42, %v4709_v56  ;;  %v4699_v3 = vld [vmem:[%s6903_s10 + $0x1] ss:$0 sm:$0xff] }
 0xefd   : > { %5232 = vmatmul.mubr.msk.f32.vlgmr.msra.gmra.mrb[36].mxu1 %vm1018_vm3, %v3550_v20 }
 0xefe   : > { %5504 = vmatpush3.bf16.xpose.msk.msra.mxu1 %vm6181_vm2, %v6555_v15  ;;  %5245 = vmatprep.mubr.msk.f32.mxu1 %vm5869_vm1, %v5870_v17 }
 0xeff   : > { %5508 = vmatprep.subr.bf16.mxu1 %v5868_v16 }
 0xf05   : > { %5246 = vmatmul.mubr.msk.f32.vlgmr.msra.gmra.mrb[40].mxu1 %vm653_vm0, %v3711_v12 }
 0xf06   : > { %5510 = vmatpush3.bf16.msra.mxu1 %v5509_v1  ;;  %5259 = vmatprep.mubr.msk.f32.mxu1 %vm5869_vm1, %v5870_v17 }
 0xfc9   : > { %v3781_v62 = vpop.f32.mrb[18].mxu0 }
 0xfca   : > { %v3858_v63 = vmul.f32 1.442695, %v3781_v62  ;;  %v5240_v25 = vpop.f32.mrb[19].mxu0 }
 0xfcc   : > { %5713 = vpow2.f32 %v3858_v63  ;;  %v4700_v63 = vld [vmem:[%s6968_s1 + $0x1] ss:$0 sm:$0xff]  ;;  %s5796_s1 = sshll.u32 %s5871_s15, 4  ;;  %s5797_s1 = int_to_ptr.vmem [resolvable:$false] %s5796_s1 }
 0xfcd   : > { %s5798_s3 = scalar_lea.vmem %s5797_s1, 64  ;;  %p5799_p0 = scmp.lt.s32.totalorder %s6851_s22, %s5797_s1 }
 0xfce   : > { %p5800_p6 = scmp.lt.s32.totalorder %s5798_s3, %s5792_s0 }
 0xfd0   : > { %p5801_p13 = por %p5800_p6, %p5799_p0 }
 0xfd2   : > { %p5802_p7 = pnand %p5801_p13, %p5795_p5 }
 0xfd6   : > { %v5714_v15 = vpop.eup %5713 }
 0xfd7   : > { %v3862_v33 = vsel %vm1018_vm3, %v5714_v15, 0.0 }
 0xfd8   : > { %3863 = vadd.xlane.f32.xlu0 %v3862_v33  ;;  %v3854_v16 = vpop.f32.mrb[40].mxu1 }
 0xfd9   : > { %v3860_v13 = vmul.f32 1.442695, %v3854_v16  ;;  %v5247_v50 = vpop.f32.mrb[41].mxu1 }
 0xfda   : > { %v4712_v50 = vld [vmem:[%s6907_s14 + $0x98] sm:$0xff] }
 0xfdb   : > { %5715 = vpow2.f32 %v3860_v13  ;;  %v4711_v13 = vld [vmem:[%s6907_s14 + $0x90] sm:$0xff] }
 0xfe5   : > { %v5716_v41 = vpop.eup %5715 }
 0xfe6   : > { %v3865_v30 = vsel %vm1018_vm3, %v5716_v41, 0.0 }
 0xfe7   : > { %3866 = vadd.xlane.f32.xlu1 %v3865_v30  ;;  %v4713_v30 = vld [vmem:[%s6907_s14 + $0xa0] sm:$0xff] }
0x1065   : > { %v3864_v10 = vpop.xlane.xlu0 %3863 }
0x1066   : > { %5717 = vrcp.f32 %v3864_v10  ;;  %v4714_v10 = vld [vmem:[%s6907_s14 + $0xa8] sm:$0xff] }
0x1070   : > { %v5718_v18 = vpop.eup %5717 }
0x1071   : > { %v3869_v17 = vmul.f32 %v5718_v18, %v5714_v15  ;;  %v5535_v18 = vpack.c.bf16 %v4714_v10, %v4713_v30 }
0x1073   : > { %5253 = vmatmul.mubr.msk.f32.vlgmr.msra.gmra.mrb[14].mxu0 %vm1018_vm3, %v3869_v17  ;;  %v4715_v17 = vld [vmem:[%s6907_s14 + $0xb0] sm:$0xff] }
0x1074   : > { %v3867_v1 = vpop.xlane.xlu1 %3866  ;;  %5514 = vmatpush3.bf16.msra.mxu0 %v5511_v24  ;;  %v4720_v24 = vld [vmem:[%s6907_s14 + $0xd8] sm:$0xff] }
0x1075   : > { %5719 = vrcp.f32 %v3867_v1  ;;  %5516 = vmatprep.subr.bf16.mxu0 %v5515_v59  ;;  %v4716_v1 = vld [vmem:[%s6907_s14 + $0xb8] sm:$0xff]  ;;  %v5547_v58 = vpack.c.bf16 %v4720_v24, %v4719_v23 }
0x1078   : > { %5518 = vmatpush3.bf16.msra.mxu0 %v5515_v59  ;;  %v4721_v59 = vld [vmem:[%s6907_s14 + $0xe0] sm:$0xff] }
0x1079   : > { %5528 = vmatprep.subr.bf16.mxu0 %v5527_v40 }
0x107f   : > { %v5720_v11 = vpop.eup %5719 }
0x1080   : > { %v3871_v21 = vmul.f32 %v5720_v11, %v5716_v41  ;;  %v5531_v41 = vpack.c.bf16 %v4712_v50, %v4711_v13  ;;  %v5539_v11 = vpack.c.bf16 %v4716_v1, %v4715_v17  ;;  %v4729_v17 = vld [vmem:[%s6971_s26 + $0x1] ss:$0 sm:$0xff] }
0x1082   : > { %5260 = vmatmul.mubr.msk.f32.vlgmr.msra.gmra.mrb[36].mxu1 %vm1018_vm3, %v3871_v21  ;;  %v4717_v21 = vld [vmem:[%s6907_s14 + $0xc0] sm:$0xff] }
0x1083   : > { %v5543_v26 = vpack.c.bf16 %v4718_v22, %v4717_v21  ;;  %v4730_v21 = vld [vmem:[%s6973_s23 + $0x1] ss:$0 sm:$0xff] }
0x1146   : > { %v3945_v8 = vpop.f32.mrb[14].mxu0 }
0x1147   : > { %v5254_v34 = vpop.f32.mrb[15].mxu0  ;;  %5270 = vmatprep.mubr.msk.f32.mxu0 %vm653_vm0, %v3945_v8  ;;  %v4722_v8 = vld [vmem:[%s6907_s14 + $0xe8] sm:$0xff] }
0x1148   : > { %v5551_v34 = vpack.c.bf16 %v4722_v8, %v4721_v59 }
0x1155   : > { %v4018_v27 = vpop.f32.mrb[36].mxu1 }
0x1156   : > { %v5261_v28 = vpop.f32.mrb[37].mxu1  ;;  %5271 = vmatmul.mubr.msk.f32.vlgmr.msra.gmra.mrb[20].mxu0 %vm653_vm0, %v4018_v27  ;;  %v4723_v27 = vld [vmem:[%s6907_s14 + $0xf0] sm:$0xff] }
0x1157   : > { %5530 = vmatpush3.bf16.msra.mxu0 %v5527_v40  ;;  %v4724_v28 = vld [vmem:[%s6907_s14 + $0xf8] sm:$0xff] }
0x1158   : > { %5532 = vmatprep.subr.bf16.mxu0 %v5531_v41 }
0x115b   : > { %5534 = vmatpush3.bf16.msra.mxu0 %v5531_v41 }
0x115c   : > { %5536 = vmatprep.subr.bf16.mxu0 %v5535_v18 }
0x115f   : > { %5538 = vmatpush3.bf16.msra.mxu0 %v5535_v18 }
0x1160   : > { %5540 = vmatprep.subr.bf16.mxu0 %v5539_v11 }
0x1163   : > { %5542 = vmatpush3.bf16.msra.mxu0 %v5539_v11 }
0x1164   : > { %5544 = vmatprep.subr.bf16.mxu0 %v5543_v26 }
0x1167   : > { %5546 = vmatpush3.bf16.msra.mxu0 %v5543_v26 }
0x1168   : > { %5548 = vmatprep.subr.bf16.mxu0 %v5547_v58 }
0x116b   : > { %5550 = vmatpush3.bf16.msra.mxu0 %v5547_v58 }
0x116c   : > { %5552 = vmatprep.subr.bf16.mxu0 %v5551_v34 }
0x116f   : > { %5554 = vmatpush3.bf16.msra.mxu0 %v5551_v34 }
0x1229   : > { %v5272_v35 = vpop.f32.mrb[20].mxu0 }
0x122a   : > { %v4115_v36 = vadd.f32 %v5272_v35, %v4694_v29  ;;  %v4109_v37 = vpop.f32.mrb[21].mxu0  ;;  %v4706_v35 = vld [vmem:[%s6969_s21 + $0x1] ss:$0 sm:$0xff] }
0x122b   : > { %v4110_v7 = vadd.f32 %v4694_v29, %v4109_v37  ;;  %v5555_v29 = vpack.c.bf16 %v4724_v28, %v4723_v27 }
0x122c   : > { %v4119_v14 = vadd.f32 %v4115_v36, %v6576_v6 }
0x122d   : > { %v4118_v38 = vadd.f32 %v4110_v7, %v6563_v31  ;;  %v4701_v31 = vld [vmem:[%s6905_s12 + $0x20] sm:$0xff]  ;;  %5556 = vmatprep.subr.bf16.mxu0 %v5555_v29 }
0x122e   : > { %v4127_v39 = vsel %vm653_vm0, %v4119_v14, 0.0  ;;  %v5519_v55 = vpack.c.bf16 %v4702_v54, %v4701_v31  ;;  %5558 = vmatpush3.bf16.msra.mxu0 %v5555_v29 }
0x122f   : > { %4128 = vadd.xlane.f32.xlu1 %v4127_v39  ;;  %v4124_v43 = vsel %vm653_vm0, %v4118_v38, 0.0 }
0x1230   : > { %4125 = vadd.xlane.f32.xlu0 %v4124_v43  ;;  %5520 = vmatprep.subr.bf16.mxu1 %v5519_v55 }
0x1231   : > { %5522 = vmatpush3.bf16.msra.mxu1 %v5519_v55 }
0x1232   : > { %5524 = vmatprep.subr.bf16.mxu1 %v5523_v48 }
0x1235   : > { %5526 = vmatpush3.bf16.msra.mxu1 %v5523_v48  ;;  %v4726_v48 = vld [vmem:[%s6970_s11 + $0x1] ss:$0 sm:$0xff] }
0x12bc   : > { %v4129_v44 = vpop.xlane.xlu1 %4128 }
0x12bd   : > { %v4131_v45 = vmul.f32 0.03125, %v4129_v44  ;;  %v4126_v46 = vpop.xlane.xlu0 %4125 }
0x12be   : > { %v4130_v47 = vmul.f32 0.03125, %v4126_v46 }
0x12bf   : > { %v4133_v49 = vsub.f32 %v4119_v14, %v4131_v45 }
0x12c0   : > { %v4132_v51 = vsub.f32 %v4118_v38, %v4130_v47 }
0x12c1   : > { %v4135_v52 = vmul.f32 %v4133_v49, %v4133_v49 }
0x12c2   : > { %v4134_v53 = vmul.f32 %v4132_v51, %v4132_v51 }
0x12c3   : > { %v4139_v5 = vsel %vm653_vm0, %v4135_v52, 0.0 }
0x12c4   : > { %4140 = vadd.xlane.f32.xlu1 %v4139_v5  ;;  %v4136_v6 = vsel %vm653_vm0, %v4134_v53, 0.0 }
0x12c5   : > { %4137 = vadd.xlane.f32.xlu0 %v4136_v6 }
0x1351   : > { %v4141_v57 = vpop.xlane.xlu1 %4140 }
0x1352   : > { %v4143_v0 = vmul.f32 0.03125, %v4141_v57  ;;  %v4138_v2 = vpop.xlane.xlu0 %4137 }
0x1353   : > { %v4142_v4 = vmul.f32 0.03125, %v4138_v2 }
0x1354   : > { %v4145_v9 = vadd.f32 1e-05, %v4143_v0 }
0x1355   : > { %v4144_v19 = vadd.f32 1e-05, %v4142_v4 }
0x1356   : > { %5721 = vrsqrt.f32 %v4145_v9 }
0x1357   : > { %5723 = vrsqrt.f32 %v4144_v19 }
0x1360   : > { %v5722_v32 = vpop.eup %5721 }
0x1361   : > { %v5724_v20 = vpop.eup %5723  ;;  %v4149_v12 = vmul.f32 %v5722_v32, %v4133_v49 }
0x1362   : > { %v4148_v62 = vmul.f32 %v5724_v20, %v4132_v51 }
0x1363   : > { %v4157_v25 = vmul.f32 %v4699_v3, %v4149_v12 }
0x1364   : > { %v4156_v15 = vmul.f32 %v4699_v3, %v4148_v62 }
0x1365   : > { %v6776_v16 = vadd.f32 %v4700_v63, %v4157_v25 }
0x1366   : > { %v6774_v33 = vadd.f32 %v4700_v63, %v4156_v15 }
0x1368   : > { %5281 = vmatprep.mubr.msk.f32.mxu1 %vm653_vm0, %v6774_v33 }
0x1369   : > { %5282 = vmatmul.mubr.msk.f32.vlgmr.msra.gmra.mrb[42].mxu1 %vm653_vm0, %v6776_v16 }
0x143c   : > { %v5283_v36 = vpop.f32.mrb[42].mxu1 }
0x143d   : > { %v4257_v37 = vadd.f32 %v5283_v36, %v4706_v35  ;;  %v4251_v7 = vpop.f32.mrb[43].mxu1 }
0x143e   : > { %v4252_v14 = vadd.f32 %v4706_v35, %v4251_v7 }
0x143f   : > { %v4263_v38 = vmul.f32 0.044715, %v4257_v37  ;;  %v4261_v55 = vmul.f32 0.5, %v4257_v37 }
0x1440   : > { %v4262_v39 = vmul.f32 0.044715, %v4252_v14  ;;  %v4260_v31 = vmul.f32 0.5, %v4252_v14 }
0x1441   : > { %v4265_v43 = vmul.f32 %v4263_v38, %v4257_v37 }
0x1442   : > { %v4264_v44 = vmul.f32 %v4262_v39, %v4252_v14 }
0x1443   : > { %v4267_v45 = vmul.f32 %v4265_v43, %v4257_v37 }
0x1444   : > { %v4266_v46 = vmul.f32 %v4264_v44, %v4252_v14 }
0x1445   : > { %v4269_v47 = vadd.f32 %v4267_v45, %v4257_v37 }
0x1446   : > { %v4268_v49 = vadd.f32 %v4266_v46, %v4252_v14 }
0x1447   : > { %v4271_v51 = vmul.f32 0.7978846, %v4269_v47 }
0x1448   : > { %v4270_v52 = vmul.f32 0.7978846, %v4268_v49 }
0x1449   : > { %5725 = vtanh.f32 %v4271_v51 }
0x144a   : > { %5727 = vtanh.f32 %v4270_v52 }
0x1453   : > { %v5726_v53 = vpop.eup %5725 }
0x1454   : > { %v5728_v5 = vpop.eup %5727  ;;  %v4275_v6 = vadd.f32 1.0, %v5726_v53 }
0x1455   : > { %v4274_v54 = vadd.f32 1.0, %v5728_v5 }
0x1456   : > { %v4277_v61 = vmul.f32 %v4275_v6, %v4261_v55 }
0x1457   : > { %v4276_v60 = vmul.f32 %v4274_v54, %v4260_v31 }
0x1459   : > { %5316 = vmatprep.mubr.f32.mxu0 %v4276_v60 }
0x145a   : > { %5317 = vmatmul.mubr.f32.vlgmr.msra.gmra.mrb[22].mxu0 %v4277_v61 }
0x152d   : > { %v5318_v56 = vpop.f32.mrb[22].mxu0 }
0x152e   : > { %v4375_v42 = vadd.f32 %v5318_v56, %v4726_v48  ;;  %v4369_v40 = vpop.f32.mrb[23].mxu0 }
0x152f   : > { %v4370_v57 = vadd.f32 %v4726_v48, %v4369_v40 }
0x1530   : > { %v4379_v0 = vadd.f32 %v4375_v42, %v6776_v16 }
0x1531   : > { %v4378_v2 = vadd.f32 %v4370_v57, %v6774_v33 }
0x1532   : > { %v4387_v4 = vsel %vm653_vm0, %v4379_v0, 0.0 }
0x1533   : > { %4388 = vadd.xlane.f32.xlu1 %v4387_v4  ;;  %v4384_v9 = vsel %vm653_vm0, %v4378_v2, 0.0 }
0x1534   : > { %4385 = vadd.xlane.f32.xlu0 %v4384_v9 }
0x15c0   : > { %v4389_v19 = vpop.xlane.xlu1 %4388 }
0x15c1   : > { %v4391_v32 = vmul.f32 0.03125, %v4389_v19  ;;  %v4386_v3 = vpop.xlane.xlu0 %4385 }
0x15c2   : > { %v4390_v20 = vmul.f32 0.03125, %v4386_v3 }
0x15c3   : > { %v4393_v12 = vsub.f32 %v4379_v0, %v4391_v32 }
0x15c4   : > { %v4392_v62 = vsub.f32 %v4378_v2, %v4390_v20 }
0x15c5   : > { %v4395_v63 = vmul.f32 %v4393_v12, %v4393_v12 }
0x15c6   : > { %v4394_v25 = vmul.f32 %v4392_v62, %v4392_v62 }
0x15c7   : > { %v4399_v15 = vsel %vm653_vm0, %v4395_v63, 0.0 }
0x15c8   : > { %4400 = vadd.xlane.f32.xlu1 %v4399_v15  ;;  %v4396_v16 = vsel %vm653_vm0, %v4394_v25, 0.0 }
0x15c9   : > { %4397 = vadd.xlane.f32.xlu0 %v4396_v16 }
0x1655   : > { %v4401_v33 = vpop.xlane.xlu1 %4400 }
0x1656   : > { %v4403_v13 = vmul.f32 0.03125, %v4401_v33  ;;  %v4398_v50 = vpop.xlane.xlu0 %4397 }
0x1657   : > { %v4402_v41 = vmul.f32 0.03125, %v4398_v50 }
0x1658   : > { %v4405_v30 = vadd.f32 1e-05, %v4403_v13 }
0x1659   : > { %v4404_v10 = vadd.f32 1e-05, %v4402_v41 }
0x165a   : > { %5729 = vrsqrt.f32 %v4405_v30 }
0x165b   : > { %5731 = vrsqrt.f32 %v4404_v10 }
0x1664   : > { %v5730_v18 = vpop.eup %5729 }
0x1665   : > { %v5732_v1 = vpop.eup %5731  ;;  %v4409_v11 = vmul.f32 %v5730_v18, %v4393_v12 }
0x1666   : > { %v4408_v22 = vmul.f32 %v5732_v1, %v4392_v62 }
0x1667   : > { %v4417_v23 = vmul.f32 %v4729_v17, %v4409_v11 }
0x1668   : > { %v4416_v26 = vmul.f32 %v4729_v17, %v4408_v22 }
0x1669   : > { %v4425_v24 = vadd.f32 %v4730_v21, %v4417_v23 }
0x166a   : > { %v4424_v58 = vadd.f32 %v4730_v21, %v4416_v26 }
0x166b   : > { %v4433_v59 = vsel %vm653_vm0, %v4425_v24, 0.0 }
0x166c   : > { %v4434_v8 = vrot.slane %v4433_v59, 4  ;;  %v4426_v34 = vsel %vm653_vm0, %v4424_v58, 0.0 }
0x166d   : > { %v4427_v27 = vrot.slane %v4426_v34, 4 }
0x166e   : > { %v4435_v28 = vadd.f32 %v4434_v8, %v4433_v59 }
0x166f   : > { %v4428_v29 = vadd.f32 %v4427_v27, %v4426_v34 }
0x1670   : > { %v4436_v35 = vrot.slane %v4435_v28, 2 }
0x1671   : > { %v4429_v36 = vrot.slane %v4428_v29, 2 }
0x1672   : > { %v4437_v37 = vadd.f32 %v4436_v35, %v4435_v28 }
0x1673   : > { %v4430_v7 = vadd.f32 %v4429_v36, %v4428_v29 }
0x1674   : > { %v4438_v14 = vrot.slane %v4437_v37, 1 }
0x1675   : > { %v4431_v38 = vrot.slane %v4430_v7, 1 }
0x1676   : > { %v4439_v39 = vadd.f32 %v4438_v14, %v4437_v37 }
0x1677   : > { %v4432_v43 = vadd.f32 %v4431_v38, %v4430_v7 }
0x1678   : > { %v4442_v44 = vmul.f32 0.125, %v4439_v39 }
0x1679   : > { %v4441_v45 = vmul.f32 0.125, %v4432_v43 }
0x167b   : > { %v4446_v46 = vsel %vm4445_vm4, %v4442_v44, %v4441_v45 }
0x167c   : > { %4449 = vst.msk [vmem:[%s624_s29] sm:$0x3] %vm4448_vm5, %v4446_v46 }
0x167d   : > { %5805 = shalt.err (!%p5802_p7)
}
0x167e   : > { %s5806_s19 = scalar_lea.hbm %s6849_s16, 32  ;;  %s5810_s20 = scalar_lea.hbm %s6975_s25, 64 }
0x167f   : > { %p5807_p3 = scmp.ne.s32.totalorder %s6849_s16, %s5806_s19  ;;  %p5811_p11 = scmp.lt.u32.totalorder %s6849_s16, %s6975_s25 }
0x1680   : > { %p5812_p8 = scmp.lt.u32.totalorder %s5810_s20, %s5806_s19  ;;  %p5814_p10 = scmp.lt.u32.totalorder %s5806_s19, %s6849_s16 }
0x1681   : > { %p5808_p12 = pnand %p5807_p3, %p6976_p2 }
0x1682   : > { %p5813_p9 = por %p5812_p8, %p5811_p11 }
0x1683   : > { %p5809_p1 = pneg %p5808_p12 }
0x1684   : > { %p5815_p4 = por %p5814_p10, %p5813_p9 }
0x1686   : > { %p5816_p5 = pnand %p5815_p4, %p5809_p1 }
0x1688   : > { %5819 = shalt.err (!%p5816_p5)
}
0x1689   : > { %5589 = dma.vmem_to_hbm [thread:$0]  (%p6976_p2), %s6851_s22, 32, %s6849_s16, %s4451_s18  }
0x168a PF: > { %s6977_s3 = sld [smem:[#allocation11_spill]]  ;;  %s6978_s0 = sld [smem:[#allocation16_spill]] }
0x168b   : > { %p6980_p6 = scmp.ge.s32.totalorder %s5862_s30, 2 }
0x1690   : > { %s4476_s15 = sand.u32 1, %s6977_s3   ;;  %p6979_p0 = scmp.ne.s32.totalorder %s6978_s0, 0 }
0x1691   : > { %s4477_s17 = scalar_lea.sflag [#allocation4], %s4476_s15 }
0x1692   : > { %p5600_p13 = pnand %p6980_p6, %p6979_p0 }
0x1694   : > { %5845 = dma.done.wait (!%p5600_p13), %s4477_s17, 32  }
0x1695   : > { %5847 = vsyncadd (!%p5600_p13), %s4477_s17, 4294967264  ;;  %s6981_s30 = sld [smem:[#allocation13_spill]]  ;;  %s6982_s19 = sld [smem:[#allocation12_spill]] }
0x1696   : > { %s6983_s29 = sld [smem:[#allocation14_spill]]  ;;  %s6984_s27 = smov %s5854_s28 }
0x169b   : > { %p32_p7 = scmp.ge.s32.totalorder %s6981_s30, 4   ;;  %s6985_s28 = smov %s6982_s19 }
0x169d   :  { %34 = sbr.rel (!%p32_p7) target bundleno = 17 (0x11), region = 161 }
0x16a4   :  { %4482 = vsyncpa [#allocation3], 1 }
0x16a5   :  { %4484 = vsyncpa [#allocation3 + $0x1], 1 }
0x16a6   :  { %4485 = vsyncpa [#allocation6], 1 }
0x16a7   :  { %4486 = vsyncpa [#allocation4], 1 }
0x16a8   :  { %4488 = vsyncpa [#allocation4 + $0x1], 1 }

</bundles_post_ra>
